<compile_context>
chip_gen: v7x
topology: tpu7x:2x2x1
jax: 0.10.0
libtpu: 0.0.40
codegen_flags: <defaults>
</compile_context>

<pallas_src>
import functools

import jax
import jax.numpy as jnp
from jax.experimental import pallas as pl
from jax.experimental.pallas import tpu as pltpu


def _lane_sum(x, lanes=128):
    """Reduce [TB, TN] (TN % lanes == 0) to a lane-dense [TB, lanes] partial
    using static lane-aligned column slices (free views, no per-step XLU)."""
    n = x.shape[-1] // lanes
    acc = x[:, 0:lanes]
    for j in range(1, n):
        acc = acc + x[:, j * lanes:(j + 1) * lanes]
    return acc


def _log_mse_kernel(x_ref, t1_ref, t2_ref, m_ref, out_ref,
                    num_acc, den_acc, *, c, alpha):
    k = pl.program_id(1)                      # reduction (N) axis, last grid dim

    @pl.when(k == 0)
    def _():
        num_acc[...] = jnp.zeros_like(num_acc)
        den_acc[...] = jnp.zeros_like(den_acc)

    # Side inputs may arrive in bf16 (caller contract to cut HBM traffic);
    # all math and accumulation stays f32.
    x = x_ref[...].astype(jnp.float32)        # [TB, TN]
    t1 = t1_ref[...].astype(jnp.float32)
    t2 = t2_ref[...].astype(jnp.float32)
    m = m_ref[...].astype(jnp.float32)

    log_t = jnp.log(t1)

    # weight = 1.0 where t2 >= c, else (t2 / c) ** alpha
    ratio = t2 * jnp.float32(1.0 / c)
    if alpha == 0.75:
        # r^0.75 = sqrt(r) * sqrt(sqrt(r)); sqrt(0) == 0 so neither the 1e-30
        # clamp nor the t2 > 0 select is needed (saves VALU + EUP exp/log).
        s = jnp.sqrt(ratio)
        w_small = s * jnp.sqrt(s)
    else:
        # Generic alpha: t2 == 0 -> exactly 0 (matches reference).
        # NOTE: t2 < 0 would be NaN in the PyTorch reference; co-occurrence
        # counts are non-negative so this path clamps instead.
        w_small = jnp.exp(jnp.float32(alpha) *
                          jnp.log(jnp.maximum(ratio, jnp.float32(1e-30))))
        w_small = jnp.where(t2 > 0.0, w_small, jnp.float32(0.0))
    weight = jnp.where(t2 >= jnp.float32(c), jnp.float32(1.0), w_small)

    diff = x - log_t
    per_elem = diff * diff * weight * m                       # [TB, TN]

    # Lane-dense accumulation: one (TB,128) RMW per step; XLU reduce deferred.
    num_acc[...] += _lane_sum(per_elem)
    den_acc[...] += _lane_sum(m)

    @pl.when(k == pl.num_programs(1) - 1)
    def _():
        num = jnp.sum(num_acc[...], axis=-1, keepdims=True)   # [TB, 1]
        den = jnp.sum(den_acc[...], axis=-1, keepdims=True)
        # Rows whose mask sums to 0 give inf/NaN, matching the reference.
        out_ref[...] = num / den


def _round_up(x, m):
    return ((x + m - 1) // m) * m


def _pick_tiles(B, N, bytes_per_elem):
    """Tiles aligned to (8,128), sized for MiB-scale DMAs per grid step,
    >= 2 row tiles when possible (v7x has 2 TensorCores), and a
    double-buffered input footprint under v5e's 16 MiB scoped-VMEM default."""
    TN = min(2048, _round_up(N, 128))
    B8 = _round_up(B, 8)
    TB = min(256, B8)
    if B8 >= 16 and pl.cdiv(B8, TB) < 2:      # keep both v7x TCs busy
        TB = _round_up(max(8, B8 // 2), 8)

    budget = 13 * 1024 * 1024                 # margin under v5e's 16 MiB scoped
    def step_bytes(tb, tn):
        return 2 * tb * tn * bytes_per_elem   # 2 pipeline buffers per input
    while step_bytes(TB, TN) > budget and TN > 128:
        TN = max(128, _round_up(TN // 2, 128))
    while step_bytes(TB, TN) > budget and TB > 8:
        TB = max(8, _round_up(TB // 2, 8))
    return TB, TN


def _pad2d(x, rows, cols, col_val, row_val):
    B, N = x.shape
    if cols > N:
        x = jnp.pad(x, ((0, 0), (0, cols - N)), constant_values=col_val)
    if rows > B:
        x = jnp.pad(x, ((0, rows - B), (0, 0)), constant_values=row_val)
    return x


def log_mse_loss(inputs, target_1, target_2, mask, c=10.0, alpha=0.75):
    """Pallas TPU implementation of Log_MSELoss.forward. Returns a scalar.

    The kernel is HBM-bandwidth bound, so callers may pass target_2 / mask
    (and target_1 if log-precision allows) as bfloat16 to cut bytes/element;
    the kernel casts to f32 internally and accumulates in f32.
    """
    assert inputs.shape == target_1.shape == target_2.shape == mask.shape
    B, N = inputs.shape
    bytes_per_elem = sum(jnp.dtype(a.dtype).itemsize
                         for a in (inputs, target_1, target_2, mask))
    TB, TN = _pick_tiles(B, N, bytes_per_elem)
    B_pad, N_pad = _round_up(B, TB), _round_up(N, TN)

    if (B_pad, N_pad) != (B, N):
        # Padded columns: mask=0 (zero num/den contribution), target_1=1 so
        # log()=0 and diff=0 (no inf*0 NaN). Padded rows: mask=1 keeps the
        # per-row divide finite; they are sliced off before the batch mean.
        inputs = _pad2d(inputs, B_pad, N_pad, 0.0, 0.0)
        target_1 = _pad2d(target_1, B_pad, N_pad, 1.0, 1.0)
        target_2 = _pad2d(target_2, B_pad, N_pad, float(c), float(c))
        mask = _pad2d(mask, B_pad, N_pad, 0.0, 1.0)

    grid = (B_pad // TB, N_pad // TN)
    in_spec = pl.BlockSpec((TB, TN), lambda i, k: (i, k))
    kernel = functools.partial(_log_mse_kernel, c=float(c), alpha=float(alpha))

    per_row = pl.pallas_call(
        kernel,
        out_shape=jax.ShapeDtypeStruct((B_pad, 1), jnp.float32),
        grid=grid,
        in_specs=[in_spec, in_spec, in_spec, in_spec],
        out_specs=pl.BlockSpec((TB, 1), lambda i, k: (i, 0)),
        scratch_shapes=[
            pltpu.VMEM((TB, 128), jnp.float32),   # lane-dense numerator
            pltpu.VMEM((TB, 128), jnp.float32),   # lane-dense denominator
        ],
        compiler_params=pltpu.CompilerParams(
            dimension_semantics=("parallel", "arbitrary")),
    )(inputs, target_1, target_2, mask)

    # Batch mean in the wrapper so the row-tile axis stays megacore-parallel.
    return jnp.mean(per_row[:B, 0])


def _reference(inputs, target_1, target_2, mask, c=10.0, alpha=0.75):
    inputs = inputs.astype(jnp.float32)
    target_1 = target_1.astype(jnp.float32)
    target_2 = target_2.astype(jnp.float32)
    mask = mask.astype(jnp.float32)
    log_t = jnp.log(target_1)
    weight = jnp.where(target_2 >= c, 1.0, (target_2 / c) ** alpha)
    loss = (inputs - log_t) ** 2 * weight * mask
    loss = loss.sum(axis=1) / mask.sum(axis=1)
    return loss.mean(axis=0)


if __name__ == "__main__":
    key = jax.random.PRNGKey(0)
    k1, k2, k3, k4 = jax.random.split(key, 4)

    # Small but deliberately non-aligned shapes: exercises the padding path,
    # a 2x2 grid (2 row tiles for v7x megacore, 2 reduction steps hitting the
    # accumulator zero/accumulate/finalize path), and the bf16 side-input
    # contract (mask 0/1 and target_2 in bf16; inputs/target_1 stay f32).
    B, N = 20, 3000

    inputs = jax.random.normal(k1, (B, N), dtype=jnp.float32)
    target_1 = jax.random.uniform(k2, (B, N), dtype=jnp.float32,
                                  minval=0.5, maxval=50.0)     # f32: feeds log()
    target_2 = jax.random.uniform(k3, (B, N), dtype=jnp.float32,
                                  minval=0.1, maxval=30.0).astype(jnp.bfloat16)
    mask = (jax.random.uniform(k4, (B, N), dtype=jnp.float32) > 0.3)
    mask = mask.astype(jnp.bfloat16).at[:, 0].set(1.0)          # 0/1 exact in bf16

    loss = log_mse_loss(inputs, target_1, target_2, mask)
    jax.block_until_ready(loss)

    ref = _reference(inputs, target_1, target_2, mask)
    assert jnp.allclose(loss, ref, rtol=1e-5, atol=1e-6), (loss, ref)

    print("KERNEL_OK")
</pallas_src>

<mosaic_0001>
module attributes {stable_mosaic.version = 11 : i64} {
  func.func @_log_mse_kernel(%arg0: i32, %arg1: i32, %arg2: memref<16x2048xf32, #tpu.memory_space<vmem>>, %arg3: memref<16x2048xf32, #tpu.memory_space<vmem>>, %arg4: memref<16x2048xbf16, #tpu.memory_space<vmem>>, %arg5: memref<16x2048xbf16, #tpu.memory_space<vmem>>, %arg6: memref<16x1xf32, #tpu.memory_space<vmem>>, %arg7: memref<16x128xf32, #tpu.memory_space<vmem>>, %arg8: memref<16x128xf32, #tpu.memory_space<vmem>>) attributes {dimension_semantics = [#tpu.dimension_semantics<parallel>, #tpu.dimension_semantics<arbitrary>], iteration_bounds = array<i64: 2, 2>, scalar_prefetch = 0 : i64, scratch_operands = 2 : i64, tpu.core_type = #tpu.core_type<tc>, window_params = [{transform_indices = @transform_0, window_bounds = array<i64: 16, 2048>}, {transform_indices = @transform_1, window_bounds = array<i64: 16, 2048>}, {transform_indices = @transform_2, window_bounds = array<i64: 16, 2048>}, {transform_indices = @transform_3, window_bounds = array<i64: 16, 2048>}, {transform_indices = @transform_4, window_bounds = array<i64: 16, 1>}]} {
    %c0_i32 = arith.constant 0 : i32
    %0 = arith.cmpi eq, %arg1, %c0_i32 : i32
    %1 = arith.extui %0 : i1 to i32
    %c0_i32_0 = arith.constant 0 : i32
    %2 = arith.cmpi ne, %1, %c0_i32_0 : i32
    scf.if %2 {
      %cst_19 = arith.constant 0.000000e+00 : f32
      %94 = vector.broadcast %cst_19 : f32 to vector<16x128xf32>
      %c0_20 = arith.constant 0 : index
      %c0_21 = arith.constant 0 : index
      %95 = vector.load %arg7[%c0_20, %c0_21] : memref<16x128xf32, #tpu.memory_space<vmem>>, vector<16x128xf32>
      tpu.vector_store %arg7[%c0_20, %c0_21], %94 {strides = array<i32>} : memref<16x128xf32, #tpu.memory_space<vmem>>, vector<16x128xf32>,
      %cst_22 = arith.constant 0.000000e+00 : f32
      %96 = vector.broadcast %cst_22 : f32 to vector<16x128xf32>
      %c0_23 = arith.constant 0 : index
      %c0_24 = arith.constant 0 : index
      %97 = vector.load %arg8[%c0_23, %c0_24] : memref<16x128xf32, #tpu.memory_space<vmem>>, vector<16x128xf32>
      tpu.vector_store %arg8[%c0_23, %c0_24], %96 {strides = array<i32>} : memref<16x128xf32, #tpu.memory_space<vmem>>, vector<16x128xf32>,
    } else {
    }
    %c0 = arith.constant 0 : index
    %c0_1 = arith.constant 0 : index
    %3 = vector.load %arg2[%c0, %c0_1] : memref<16x2048xf32, #tpu.memory_space<vmem>>, vector<16x2048xf32>
    %c0_2 = arith.constant 0 : index
    %c0_3 = arith.constant 0 : index
    %4 = vector.load %arg3[%c0_2, %c0_3] : memref<16x2048xf32, #tpu.memory_space<vmem>>, vector<16x2048xf32>
    %c0_4 = arith.constant 0 : index
    %c0_5 = arith.constant 0 : index
    %5 = vector.load %arg4[%c0_4, %c0_5] : memref<16x2048xbf16, #tpu.memory_space<vmem>>, vector<16x2048xbf16>
    %6 = arith.extf %5 : vector<16x2048xbf16> to vector<16x2048xf32>
    %c0_6 = arith.constant 0 : index
    %c0_7 = arith.constant 0 : index
    %7 = vector.load %arg5[%c0_6, %c0_7] : memref<16x2048xbf16, #tpu.memory_space<vmem>>, vector<16x2048xbf16>
    %8 = arith.extf %7 : vector<16x2048xbf16> to vector<16x2048xf32>
    %9 = math.log %4 : vector<16x2048xf32>
    %cst = arith.constant 1.000000e-01 : f32
    %10 = vector.broadcast %cst : f32 to vector<16x2048xf32>
    %11 = arith.mulf %6, %10 : vector<16x2048xf32>
    %12 = math.sqrt %11 : vector<16x2048xf32>
    %13 = math.sqrt %12 : vector<16x2048xf32>
    %14 = arith.mulf %12, %13 : vector<16x2048xf32>
    %cst_8 = arith.constant 1.000000e+01 : f32
    %15 = vector.broadcast %cst_8 : f32 to vector<16x2048xf32>
    %16 = arith.cmpf oge, %6, %15 : vector<16x2048xf32>
    %cst_9 = arith.constant 1.000000e+00 : f32
    %17 = vector.broadcast %cst_9 : f32 to vector<16x2048xf32>
    %18 = arith.select %16, %17, %14 : vector<16x2048xi1>, vector<16x2048xf32>
    %19 = arith.subf %3, %9 : vector<16x2048xf32>
    %20 = arith.mulf %19, %19 : vector<16x2048xf32>
    %21 = arith.mulf %20, %18 : vector<16x2048xf32>
    %22 = arith.mulf %21, %8 : vector<16x2048xf32>
    %c0_10 = arith.constant 0 : index
    %c0_11 = arith.constant 0 : index
    %23 = vector.load %arg7[%c0_10, %c0_11] : memref<16x128xf32, #tpu.memory_space<vmem>>, vector<16x128xf32>
    %24 = vector.extract_strided_slice %22 {offsets = [0, 0], sizes = [16, 128], strides = [1, 1]} : vector<16x2048xf32> to vector<16x128xf32>
    %25 = vector.extract_strided_slice %22 {offsets = [0, 128], sizes = [16, 128], strides = [1, 1]} : vector<16x2048xf32> to vector<16x128xf32>
    %26 = arith.addf %24, %25 : vector<16x128xf32>
    %27 = vector.extract_strided_slice %22 {offsets = [0, 256], sizes = [16, 128], strides = [1, 1]} : vector<16x2048xf32> to vector<16x128xf32>
    %28 = arith.addf %26, %27 : vector<16x128xf32>
    %29 = vector.extract_strided_slice %22 {offsets = [0, 384], sizes = [16, 128], strides = [1, 1]} : vector<16x2048xf32> to vector<16x128xf32>
    %30 = arith.addf %28, %29 : vector<16x128xf32>
    %31 = vector.extract_strided_slice %22 {offsets = [0, 512], sizes = [16, 128], strides = [1, 1]} : vector<16x2048xf32> to vector<16x128xf32>
    %32 = arith.addf %30, %31 : vector<16x128xf32>
    %33 = vector.extract_strided_slice %22 {offsets = [0, 640], sizes = [16, 128], strides = [1, 1]} : vector<16x2048xf32> to vector<16x128xf32>
    %34 = arith.addf %32, %33 : vector<16x128xf32>
    %35 = vector.extract_strided_slice %22 {offsets = [0, 768], sizes = [16, 128], strides = [1, 1]} : vector<16x2048xf32> to vector<16x128xf32>
    %36 = arith.addf %34, %35 : vector<16x128xf32>
    %37 = vector.extract_strided_slice %22 {offsets = [0, 896], sizes = [16, 128], strides = [1, 1]} : vector<16x2048xf32> to vector<16x128xf32>
    %38 = arith.addf %36, %37 : vector<16x128xf32>
    %39 = vector.extract_strided_slice %22 {offsets = [0, 1024], sizes = [16, 128], strides = [1, 1]} : vector<16x2048xf32> to vector<16x128xf32>
    %40 = arith.addf %38, %39 : vector<16x128xf32>
    %41 = vector.extract_strided_slice %22 {offsets = [0, 1152], sizes = [16, 128], strides = [1, 1]} : vector<16x2048xf32> to vector<16x128xf32>
    %42 = arith.addf %40, %41 : vector<16x128xf32>
    %43 = vector.extract_strided_slice %22 {offsets = [0, 1280], sizes = [16, 128], strides = [1, 1]} : vector<16x2048xf32> to vector<16x128xf32>
    %44 = arith.addf %42, %43 : vector<16x128xf32>
    %45 = vector.extract_strided_slice %22 {offsets = [0, 1408], sizes = [16, 128], strides = [1, 1]} : vector<16x2048xf32> to vector<16x128xf32>
    %46 = arith.addf %44, %45 : vector<16x128xf32>
    %47 = vector.extract_strided_slice %22 {offsets = [0, 1536], sizes = [16, 128], strides = [1, 1]} : vector<16x2048xf32> to vector<16x128xf32>
    %48 = arith.addf %46, %47 : vector<16x128xf32>
    %49 = vector.extract_strided_slice %22 {offsets = [0, 1664], sizes = [16, 128], strides = [1, 1]} : vector<16x2048xf32> to vector<16x128xf32>
    %50 = arith.addf %48, %49 : vector<16x128xf32>
    %51 = vector.extract_strided_slice %22 {offsets = [0, 1792], sizes = [16, 128], strides = [1, 1]} : vector<16x2048xf32> to vector<16x128xf32>
    %52 = arith.addf %50, %51 : vector<16x128xf32>
    %53 = vector.extract_strided_slice %22 {offsets = [0, 1920], sizes = [16, 128], strides = [1, 1]} : vector<16x2048xf32> to vector<16x128xf32>
    %54 = arith.addf %52, %53 : vector<16x128xf32>
    %55 = arith.addf %23, %54 : vector<16x128xf32>
    %c0_12 = arith.constant 0 : index
    %c0_13 = arith.constant 0 : index
    %56 = vector.load %arg7[%c0_12, %c0_13] : memref<16x128xf32, #tpu.memory_space<vmem>>, vector<16x128xf32>
    tpu.vector_store %arg7[%c0_12, %c0_13], %55 {strides = array<i32>} : memref<16x128xf32, #tpu.memory_space<vmem>>, vector<16x128xf32>,
    %c0_14 = arith.constant 0 : index
    %c0_15 = arith.constant 0 : index
    %57 = vector.load %arg8[%c0_14, %c0_15] : memref<16x128xf32, #tpu.memory_space<vmem>>, vector<16x128xf32>
    %58 = vector.extract_strided_slice %8 {offsets = [0, 0], sizes = [16, 128], strides = [1, 1]} : vector<16x2048xf32> to vector<16x128xf32>
    %59 = vector.extract_strided_slice %8 {offsets = [0, 128], sizes = [16, 128], strides = [1, 1]} : vector<16x2048xf32> to vector<16x128xf32>
    %60 = arith.addf %58, %59 : vector<16x128xf32>
    %61 = vector.extract_strided_slice %8 {offsets = [0, 256], sizes = [16, 128], strides = [1, 1]} : vector<16x2048xf32> to vector<16x128xf32>
    %62 = arith.addf %60, %61 : vector<16x128xf32>
    %63 = vector.extract_strided_slice %8 {offsets = [0, 384], sizes = [16, 128], strides = [1, 1]} : vector<16x2048xf32> to vector<16x128xf32>
    %64 = arith.addf %62, %63 : vector<16x128xf32>
    %65 = vector.extract_strided_slice %8 {offsets = [0, 512], sizes = [16, 128], strides = [1, 1]} : vector<16x2048xf32> to vector<16x128xf32>
    %66 = arith.addf %64, %65 : vector<16x128xf32>
    %67 = vector.extract_strided_slice %8 {offsets = [0, 640], sizes = [16, 128], strides = [1, 1]} : vector<16x2048xf32> to vector<16x128xf32>
    %68 = arith.addf %66, %67 : vector<16x128xf32>
    %69 = vector.extract_strided_slice %8 {offsets = [0, 768], sizes = [16, 128], strides = [1, 1]} : vector<16x2048xf32> to vector<16x128xf32>
    %70 = arith.addf %68, %69 : vector<16x128xf32>
    %71 = vector.extract_strided_slice %8 {offsets = [0, 896], sizes = [16, 128], strides = [1, 1]} : vector<16x2048xf32> to vector<16x128xf32>
    %72 = arith.addf %70, %71 : vector<16x128xf32>
    %73 = vector.extract_strided_slice %8 {offsets = [0, 1024], sizes = [16, 128], strides = [1, 1]} : vector<16x2048xf32> to vector<16x128xf32>
    %74 = arith.addf %72, %73 : vector<16x128xf32>
    %75 = vector.extract_strided_slice %8 {offsets = [0, 1152], sizes = [16, 128], strides = [1, 1]} : vector<16x2048xf32> to vector<16x128xf32>
    %76 = arith.addf %74, %75 : vector<16x128xf32>
    %77 = vector.extract_strided_slice %8 {offsets = [0, 1280], sizes = [16, 128], strides = [1, 1]} : vector<16x2048xf32> to vector<16x128xf32>
    %78 = arith.addf %76, %77 : vector<16x128xf32>
    %79 = vector.extract_strided_slice %8 {offsets = [0, 1408], sizes = [16, 128], strides = [1, 1]} : vector<16x2048xf32> to vector<16x128xf32>
    %80 = arith.addf %78, %79 : vector<16x128xf32>
    %81 = vector.extract_strided_slice %8 {offsets = [0, 1536], sizes = [16, 128], strides = [1, 1]} : vector<16x2048xf32> to vector<16x128xf32>
    %82 = arith.addf %80, %81 : vector<16x128xf32>
    %83 = vector.extract_strided_slice %8 {offsets = [0, 1664], sizes = [16, 128], strides = [1, 1]} : vector<16x2048xf32> to vector<16x128xf32>
    %84 = arith.addf %82, %83 : vector<16x128xf32>
    %85 = vector.extract_strided_slice %8 {offsets = [0, 1792], sizes = [16, 128], strides = [1, 1]} : vector<16x2048xf32> to vector<16x128xf32>
    %86 = arith.addf %84, %85 : vector<16x128xf32>
    %87 = vector.extract_strided_slice %8 {offsets = [0, 1920], sizes = [16, 128], strides = [1, 1]} : vector<16x2048xf32> to vector<16x128xf32>
    %88 = arith.addf %86, %87 : vector<16x128xf32>
    %89 = arith.addf %57, %88 : vector<16x128xf32>
    %c0_16 = arith.constant 0 : index
    %c0_17 = arith.constant 0 : index
    %90 = vector.load %arg8[%c0_16, %c0_17] : memref<16x128xf32, #tpu.memory_space<vmem>>, vector<16x128xf32>
    tpu.vector_store %arg8[%c0_16, %c0_17], %89 {strides = array<i32>} : memref<16x128xf32, #tpu.memory_space<vmem>>, vector<16x128xf32>,
    %c1_i32 = arith.constant 1 : i32
    %91 = arith.cmpi eq, %arg1, %c1_i32 : i32
    %92 = arith.extui %91 : i1 to i32
    %c0_i32_18 = arith.constant 0 : i32
    %93 = arith.cmpi ne, %92, %c0_i32_18 : i32
    scf.if %93 {
      %c0_19 = arith.constant 0 : index
      %c0_20 = arith.constant 0 : index
      %94 = vector.load %arg7[%c0_19, %c0_20] : memref<16x128xf32, #tpu.memory_space<vmem>>, vector<16x128xf32>
      %cst_21 = arith.constant dense<0.000000e+00> : vector<16xf32>
      %95 = vector.multi_reduction <add>, %94, %cst_21 [1] : vector<16x128xf32> to vector<16xf32>
      %96 = vector.shape_cast %95 : vector<16xf32> to vector<16x1xf32>
      %c0_22 = arith.constant 0 : index
      %c0_23 = arith.constant 0 : index
      %97 = vector.load %arg8[%c0_22, %c0_23] : memref<16x128xf32, #tpu.memory_space<vmem>>, vector<16x128xf32>
      %cst_24 = arith.constant dense<0.000000e+00> : vector<16xf32>
      %98 = vector.multi_reduction <add>, %97, %cst_24 [1] : vector<16x128xf32> to vector<16xf32>
      %99 = vector.shape_cast %98 : vector<16xf32> to vector<16x1xf32>
      %100 = arith.divf %96, %99 : vector<16x1xf32>
      %c0_25 = arith.constant 0 : index
      %c0_26 = arith.constant 0 : index
      %101 = vector.load %arg6[%c0_25, %c0_26] : memref<16x1xf32, #tpu.memory_space<vmem>>, vector<16x1xf32>
      tpu.vector_store %arg6[%c0_25, %c0_26], %100 {strides = array<i32>} : memref<16x1xf32, #tpu.memory_space<vmem>>, vector<16x1xf32>,
    } else {
    }
    return
  }
  func.func @transform_0(%arg0: i32, %arg1: i32) -> (i32, i32) {
    %c0_i32 = arith.constant 0 : i32
    return %arg0, %arg1 : i32, i32
  }
  func.func @transform_1(%arg0: i32, %arg1: i32) -> (i32, i32) {
    %c0_i32 = arith.constant 0 : i32
    return %arg0, %arg1 : i32, i32
  }
  func.func @transform_2(%arg0: i32, %arg1: i32) -> (i32, i32) {
    %c0_i32 = arith.constant 0 : i32
    return %arg0, %arg1 : i32, i32
  }
  func.func @transform_3(%arg0: i32, %arg1: i32) -> (i32, i32) {
    %c0_i32 = arith.constant 0 : i32
    return %arg0, %arg1 : i32, i32
  }
  func.func @transform_4(%arg0: i32, %arg1: i32) -> (i32, i32) {
    %c0_i32 = arith.constant 0 : i32
    %c0_i32_0 = arith.constant 0 : i32
    return %arg0, %c0_i32 : i32, i32
  }
}

</mosaic_0001>

<bundles_post_ra>
// kernel: tpu_custom_call.1
= control target key start
LH: loop header
LB: loop body
LE: loop exit
PB: predicated region body
PF: predicated region fallthrough
CT: control target
= control target key end

     0   :  { %s4381_s0 = inlined_call_operand.hbm [shape: f32[32,4096], index: 0, kind: input, shape index: {}]   ;;  %s4382_s1 = inlined_call_operand.hbm [shape: f32[32,4096], index: 1, kind: input, shape index: {}]   ;;  %s4383_s2 = inlined_call_operand.hbm [shape: bf16[32,4096], index: 2, kind: input, shape index: {}]   ;;  %s4384_s3 = inlined_call_operand.hbm [shape: bf16[32,4096], index: 3, kind: input, shape index: {}]   ;;  %s4385_s4 = inlined_call_operand.vmem [shape: f32[32,1], index: 4, kind: output, shape index: {}]  }
   0x1   :  { %4548 = sst [smem:[#allocation118_spill]] %s4381_s0 }
   0x2   :  { %4549 = sst [smem:[#allocation119_spill]] %s4382_s1 }
   0x3   :  { %9 = vsyncpa [#allocation5], 0 }
   0x4   :  { %11 = vsyncpa [#allocation5 + $0x1], 0 }
   0x5   :  { %12 = vsyncpa [#allocation7], 0 }
   0x6   :  { %14 = vsyncpa [#allocation7 + $0x1], 0 }
   0x7   :  { %15 = vsyncpa [#allocation10], 0 }
   0x8   :  { %17 = vsyncpa [#allocation10 + $0x1], 0  ;;  %s2122_s15 = smov 0   ;;  %s2124_s16 = smov 0  }
   0x9   :  { %s2126_s17 = smov 0   ;;  %s2128_s18 = smov 0  }
   0xa   :  { %s2130_s19 = smov 0   ;;  %s2132_s20 = smov 0  }
   0xb   :  { %s2134_s21 = smov 0   ;;  %s2136_s22 = smov 0  }
   0xc LB: > { %4550 = sst [smem:[#allocation14_spill]] %s2081_s21  ;;  %s4386_s23 = sadd.s32 4294967295, %s2085_s22   ;;  %s2085_s22 = sphi %s2136_s22, %s23_s22   ;;  %s2081_s21 = sphi %s2134_s21, %s5115_s21   ;;  %s2077_s20 = sphi %s2132_s20, %s5120_s20   ;;  %s2073_s19 = sphi %s2130_s19, %s5113_s19   ;;  %s2069_s18 = sphi %s2128_s18, %s5119_s18   ;;  %s2065_s17 = sphi %s2126_s17, %s5118_s17   ;;  %s2061_s16 = sphi %s2124_s16, %s5117_s16   ;;  %s2057_s15 = sphi %s2122_s15, %s5116_s15  }
   0xd   : > { %s32_s24 = sadd.s32 1, %s2077_s20  ;;  %s35_s25 = sadd.s32 1, %s2081_s21 }
   0xe   : > { %p33_p0 = scmp.ge.s32.totalorder %s32_s24, 2  ;;  %s44_s26 = sadd.s32 1, %s2065_s17 }
   0xf   : > { %p51_p1 = scmp.ne.s32.totalorder %s2065_s17, %s2061_s16  ;;  %p52_p2 = scmp.eq.s32.totalorder %s2085_s22, 0 }
  0x10   : > { %s5122_s24 = smov (%p33_p0, %s32_s24), 0  ;;  %s5124_s25 = smov (!%p33_p0, %s35_s25), %s2081_s21 }
  0x11   : > { %4551 = sst [smem:[#allocation15_spill]] %s5122_s24  ;;  %s40_s27 = ssub.s32 %s2077_s20, %s5122_s24 }
  0x12   : > { %p37_p3 = scmp.ge.s32.totalorder %s5124_s25, 2  ;;  %p57_p4 = scmp.ne.s32.totalorder %s2061_s16, %s2057_s15 }
  0x13   : > { %p2173_p5 = por %p52_p2, %p51_p1  ;;  %p58_p6 = scmp.eq.s32.totalorder %s4386_s23, 0 }
  0x14   : > { %s5126_s25 = smov (%p37_p3, %s5124_s25), 0  ;;  %p1624_p8 = scmp.lt.s32.totalorder %s2085_s22, 4 }
  0x15   : > { %4553 = sst [smem:[#allocation16_spill]] %s5126_s25  ;;  %p2181_p7 = por %p58_p6, %p57_p4 }
  0x16   : > { %s39_s30 = ssub.s32 %s2081_s21, %s5126_s25  ;;  %s2189_s6 = sand.u32 1, %s2065_s17  }
  0x17   : > { %s4554_s29 = scalar_select %p2181_p7, 1, 0 }
  0x18   : > { %s41_s5 = sor.u32 %s40_s27, %s39_s30  ;;  %s4387_s7 = sshll.u32 %s2189_s6, 8 }
  0x19   : > { %p42_p9 = scmp.eq.s32.totalorder %s41_s5, 0  ;;  %s1570_s8 = sshll.u32 %s2077_s20, 4 }
  0x1a   : > { %s1599_s9 = sshll.u32 %s2081_s21, 6  ;;  %p2201_p10 = pnand %p1624_p8, %p2173_p5 }
  0x1b   : > { %s2195_s10 = scalar_select %p42_p9, %s2065_s17, %s44_s26  }
  0x1c   : > { %s2197_s11 = sadd.s32 %s1599_s9, %s1570_s8  ;;  %s215_s14 = sand.u32 1, %s2085_s22  }
  0x1d   : > { %s4388_s13 = sshll.u32 %s2197_s11, 7  ;;  %s4556_s1 = sld [smem:[#allocation119_spill]] }
  0x1e   : > { %s219_s26 = scalar_lea.vmem [#allocation6], %s4387_s7  ;;  %s2219_s8 = scalar_lea.sflag [#allocation7], %s215_s14 }
  0x1f   : > { %s229_s28 = sshll.u32 %s219_s26, 4  ;;  %p2225_p12 = pneg %p2201_p10  ;;  %s2216_s28 = int_to_ptr.vmem [resolvable:$true] %s229_s28 }
  0x23   : > { %s2212_s30 = scalar_lea.hbm %s4556_s1, %s4388_s13  ;;  %s1896_s26 = scalar_lea.hbm %s4556_s1, 16384 }
  0x24   : > { %s1891_s9 = scalar_lea.hbm %s2212_s30, 4096  ;;  %p1897_p1 = scmp.lt.u32.totalorder %s2212_s30, %s4556_s1 }
  0x25   : > { %p1892_p11 = scmp.ne.s32.totalorder %s2212_s30, %s1891_s9  ;;  %p1898_p2 = scmp.lt.u32.totalorder %s1896_s26, %s1891_s9 }
  0x26   : > { %p1900_p4 = scmp.lt.u32.totalorder %s1891_s9, %s2212_s30 }
  0x27   : > { %p1894_p13 = pnand %p2225_p12, %p1892_p11  ;;  %p1899_p3 = por %p1898_p2, %p1897_p1 }
  0x29   : > { %p1895_p0 = pneg %p1894_p13  ;;  %p1901_p5 = por %p1900_p4, %p1899_p3 }
  0x2b   : > { %p1902_p6 = pnand %p1901_p5, %p1895_p0 }
  0x2d   : > { %1905 = shalt.err (!%p1902_p6)
}
  0x2e   : > { %s1906_s14 = scalar_lea.vmem %s2216_s28, 4096  ;;  %s2087_s15 = smov [#allocation6]  }
  0x2f   : > { %p1907_p8 = scmp.ne.s32.totalorder %s2216_s28, %s1906_s14  ;;  %s1911_s27 = sshll.u32 %s2087_s15, 4  ;;  %s1912_s27 = int_to_ptr.vmem [resolvable:$false] %s1911_s27 }
  0x30   : > { %s1913_s7 = scalar_lea.vmem %s1912_s27, 8192  ;;  %p1914_p13 = scmp.lt.s32.totalorder %s2216_s28, %s1912_s27 }
  0x31   : > { %p1909_p9 = pnand %p1907_p8, %p2225_p12  ;;  %p1915_p7 = scmp.lt.s32.totalorder %s1913_s7, %s1906_s14 }
  0x33   : > { %p1910_p11 = pneg %p1909_p9  ;;  %p1916_p1 = por %p1915_p7, %p1914_p13 }
  0x35   : > { %p1917_p2 = pnand %p1916_p1, %p1910_p11 }
  0x37   : > { %1920 = shalt.err (!%p1917_p2)
}
  0x38   : > { %s4392_s13 = smov 4096   ;;  %s4393_s9 = smov 2048  }
  0x39   : > { %s4395_s26 = smov 128   ;;  %p1588_p7 = scmp.ge.s32.totalorder %s2085_s22, 1 }
  0x3a   : > { %1617 = dma.hbm_to_vmem [thread:$0]  (!%p2201_p10), %s2212_s30, 4096, %s2216_s28, %s2219_s8, %s4392_s13, %s4393_s9, %s4395_s26  }
  0x3b   : > { %p285_p0 = scmp.lt.s32.totalorder %s2085_s22, 5  ;;  %s4559_s15 = sshll.u32 %s2197_s11, 7 }
  0x3c   : > { %s4560_s0 = sld [smem:[#allocation118_spill]]  ;;  %s4561_s1 = sshll.u32 %s2189_s6, 8 }
  0x3d   : > { %p2254_p3 = pnand %p1588_p7, %p285_p0  ;;  %s195_s25 = scalar_lea.vmem [#allocation4], %s4561_s1 }
  0x3e   : > { %s205_s24 = sshll.u32 %s195_s25, 4  ;;  %s1578_s30 = sshll.u32 %s2189_s6, 7  ;;  %s2268_s24 = int_to_ptr.vmem [resolvable:$true] %s205_s24 }
  0x3f   : > { %s4558_s14 = scalar_select %p2254_p3, 1, 0 }
  0x40   : > { %s192_s28 = scalar_lea.sflag [#allocation5], %s2189_s6 }
  0x42   : > { %s2263_s5 = scalar_lea.hbm %s4560_s0, %s4559_s15  ;;  %s1926_s15 = scalar_lea.hbm %s4560_s0, 16384 }
  0x43   : > { %s1921_s13 = scalar_lea.hbm %s2263_s5, 4096  ;;  %p1927_p8 = scmp.lt.u32.totalorder %s2263_s5, %s4560_s0 }
  0x44   : > { %p1922_p4 = scmp.ne.s32.totalorder %s2263_s5, %s1921_s13  ;;  %p1928_p9 = scmp.lt.u32.totalorder %s1926_s15, %s1921_s13 }
  0x45   : > { %p1930_p13 = scmp.lt.u32.totalorder %s1921_s13, %s2263_s5 }
  0x46   : > { %p1924_p5 = pnand %p1922_p4, %p2225_p12  ;;  %p1929_p11 = por %p1928_p9, %p1927_p8 }
  0x48   : > { %p1925_p6 = pneg %p1924_p5  ;;  %p1931_p1 = por %p1930_p13, %p1929_p11 }
  0x4a   : > { %p1932_p2 = pnand %p1931_p1, %p1925_p6 }
  0x4c   : > { %1935 = shalt.err (!%p1932_p2)
}
  0x4d   : > { %s1936_s1 = scalar_lea.vmem %s2268_s24, 4096  ;;  %s2091_s25 = smov [#allocation4]  }
  0x4e   : > { %p1937_p7 = scmp.ne.s32.totalorder %s2268_s24, %s1936_s1  ;;  %s1941_s9 = sshll.u32 %s2091_s25, 4  ;;  %s1942_s9 = int_to_ptr.vmem [resolvable:$false] %s1941_s9 }
  0x4f   : > { %s1943_s26 = scalar_lea.vmem %s1942_s9, 8192  ;;  %p1944_p5 = scmp.lt.s32.totalorder %s2268_s24, %s1942_s9 }
  0x50   : > { %p1939_p0 = pnand %p1937_p7, %p2225_p12  ;;  %p1945_p3 = scmp.lt.s32.totalorder %s1943_s26, %s1936_s1 }
  0x52   : > { %p1940_p4 = pneg %p1939_p0  ;;  %p1946_p8 = por %p1945_p3, %p1944_p5 }
  0x54   : > { %p1947_p9 = pnand %p1946_p8, %p1940_p4 }
  0x56   : > { %1950 = shalt.err (!%p1947_p9)
}
  0x57   : > { %s4562_s13 = smov 128   ;;  %s4563_s27 = smov 2048  }
  0x58   : > { %s4564_s15 = smov 4096   ;;  %s4565_s7 = sshll.u32 %s2197_s11, 6 }
  0x59   : > { %1614 = dma.hbm_to_vmem [thread:$0]  (!%p2201_p10), %s2263_s5, 4096, %s2268_s24, %s192_s28, %s4564_s15, %s4563_s27, %s4562_s13  }
  0x5a   : > { %s2302_s1 = scalar_lea.hbm %s4383_s2, %s4565_s7  ;;  %s243_s26 = scalar_lea.vmem [#allocation8], %s1578_s30 }
  0x5b   : > { %s253_s0 = sshll.u32 %s243_s26, 4  ;;  %s1951_s21 = scalar_lea.hbm %s2302_s1, 2048  ;;  %s2306_s0 = int_to_ptr.vmem [resolvable:$true] %s253_s0 }
  0x5c   : > { %p1952_p3 = scmp.ne.s32.totalorder %s2302_s1, %s1951_s21  ;;  %s1956_s28 = scalar_lea.hbm %s4383_s2, 8192 }
  0x5d   : > { %p1957_p13 = scmp.lt.u32.totalorder %s2302_s1, %s4383_s2  ;;  %p1958_p1 = scmp.lt.u32.totalorder %s1956_s28, %s1951_s21 }
  0x5e   : > { %p1954_p6 = pnand %p1952_p3, %p2225_p12  ;;  %p1960_p7 = scmp.lt.u32.totalorder %s1951_s21, %s2302_s1 }
  0x5f   : > { %p1959_p2 = por %p1958_p1, %p1957_p13 }
  0x60   : > { %p1955_p11 = pneg %p1954_p6 }
  0x61   : > { %p1961_p0 = por %p1960_p7, %p1959_p2 }
  0x63   : > { %p1962_p4 = pnand %p1961_p0, %p1955_p11 }
  0x65   : > { %1965 = shalt.err (!%p1962_p4)
}
  0x66   : > { %s1966_s7 = scalar_lea.vmem %s2306_s0, 2048  ;;  %s2092_s25 = smov [#allocation8]  }
  0x67   : > { %p1967_p5 = scmp.ne.s32.totalorder %s2306_s0, %s1966_s7  ;;  %s1971_s9 = sshll.u32 %s2092_s25, 4  ;;  %s1972_s9 = int_to_ptr.vmem [resolvable:$false] %s1971_s9 }
  0x68   : > { %s1973_s26 = scalar_lea.vmem %s1972_s9, 4096  ;;  %p1974_p3 = scmp.lt.s32.totalorder %s2306_s0, %s1972_s9 }
  0x69   : > { %p1969_p8 = pnand %p1967_p5, %p2225_p12  ;;  %p1975_p6 = scmp.lt.s32.totalorder %s1973_s26, %s1966_s7 }
  0x6b   : > { %p1970_p9 = pneg %p1969_p8  ;;  %p1976_p13 = por %p1975_p6, %p1974_p3 }
  0x6d   : > { %p1977_p1 = pnand %p1976_p13, %p1970_p9 }
  0x6f   : > { %1980 = shalt.err (!%p1977_p1)
}
  0x70   : > { %s2093_s21 = smov 1024   ;;  %s2094_s24 = smov 64  }
  0x71   : > { %1620 = dma.hbm_to_vmem [thread:$0]  (!%p2201_p10), %s2302_s1, 2048, %s2306_s0, %s2219_s8, %s4563_s27, %s2093_s21, %s2094_s24  }
  0x72   : > { %s4566_s5 = sshll.u32 %s2197_s11, 6  ;;  %s267_s7 = scalar_lea.vmem [#allocation9], %s1578_s30 }
  0x73   : > { %s2338_s15 = scalar_lea.hbm %s4384_s3, %s4566_s5  ;;  %s277_s25 = sshll.u32 %s267_s7, 4  ;;  %s2342_s25 = int_to_ptr.vmem [resolvable:$true] %s277_s25 }
  0x74   : > { %s264_s9 = scalar_lea.sflag [#allocation10], %s2189_s6  ;;  %s1981_s26 = scalar_lea.hbm %s2338_s15, 2048 }
  0x75   : > { %p1982_p11 = scmp.ne.s32.totalorder %s2338_s15, %s1981_s26  ;;  %s1986_s8 = scalar_lea.hbm %s4384_s3, 8192 }
  0x76   : > { %p1987_p0 = scmp.lt.u32.totalorder %s2338_s15, %s4384_s3  ;;  %p1988_p4 = scmp.lt.u32.totalorder %s1986_s8, %s1981_s26 }
  0x77   : > { %p1984_p2 = pnand %p1982_p11, %p2225_p12  ;;  %p1990_p8 = scmp.lt.u32.totalorder %s1981_s26, %s2338_s15 }
  0x78   : > { %p1989_p5 = por %p1988_p4, %p1987_p0 }
  0x79   : > { %p1985_p7 = pneg %p1984_p2 }
  0x7a   : > { %p1991_p9 = por %p1990_p8, %p1989_p5 }
  0x7c   : > { %p1992_p3 = pnand %p1991_p9, %p1985_p7 }
  0x7e   : > { %1995 = shalt.err (!%p1992_p3)
}
  0x7f   : > { %s1996_s30 = scalar_lea.vmem %s2342_s25, 2048  ;;  %s2095_s28 = smov [#allocation9]  }
  0x80   : > { %p1997_p6 = scmp.ne.s32.totalorder %s2342_s25, %s1996_s30  ;;  %s2001_s13 = sshll.u32 %s2095_s28, 4  ;;  %s2002_s13 = int_to_ptr.vmem [resolvable:$false] %s2001_s13 }
  0x81   : > { %s2003_s7 = scalar_lea.vmem %s2002_s13, 4096  ;;  %p2004_p11 = scmp.lt.s32.totalorder %s2342_s25, %s2002_s13 }
  0x82   : > { %p1999_p13 = pnand %p1997_p6, %p2225_p12  ;;  %p2005_p2 = scmp.lt.s32.totalorder %s2003_s7, %s1996_s30 }
  0x84   : > { %p2000_p1 = pneg %p1999_p13  ;;  %p2006_p0 = por %p2005_p2, %p2004_p11 }
  0x86   : > { %p2007_p4 = pnand %p2006_p0, %p2000_p1 }
  0x88   : > { %2010 = shalt.err (!%p2007_p4)
}
  0x89   : > { %1623 = dma.hbm_to_vmem [thread:$0]  (!%p2201_p10), %s2338_s15, 2048, %s2342_s25, %s264_s9, %s4563_s27, %s2093_s21, %s2094_s24  }
  0x8a   : > { %p4567_p12 = scmp.ne.s32.totalorder %s4558_s14, 0 }
  0x8c   : > { %289 = sbr.rel (%p4567_p12) target bundleno = 616 (0x268), region = 36 }
  0x93   : > { %s291_s23 = sand.u32 1, %s2061_s16   ;;  %p4568_p7 = scmp.ne.s32.totalorder %s4554_s29, 0 }
  0x94   : > { %s1589_s26 = sshll.u32 %s291_s23, 8  ;;  %s292_s0 = scalar_lea.sflag [#allocation5], %s291_s23 }
  0x95   : > { %s2374_s11 = scalar_lea.vmem [#allocation4], %s1589_s26 }
  0x96   : > { %2044 = dma.done.wait (%p4568_p7), %s292_s0, 4096  }
  0x97   : > { %2046 = vsyncadd (%p4568_p7), %s292_s0, 4294963200  ;;  %s4569_s6 = sadd.s32 4294967295, %s2085_s22   ;;  %s2382_s21 = scalar_lea.vmem [#allocation6], %s1589_s26 }
  0x98   : > { %s300_s12 = sand.u32 1, %s4569_s6  }
  0x99   : > { %s301_s27 = scalar_lea.sflag [#allocation7], %s300_s12 }
  0x9a   : > { %2048 = dma.done.wait (%p4568_p7), %s301_s27, 6144  }
  0x9b   : > { %2050 = vsyncadd (%p4568_p7), %s301_s27, 4294961152  ;;  %s1591_s14 = sshll.u32 %s291_s23, 7  ;;  %s319_s15 = scalar_lea.sflag [#allocation10], %s291_s23 }
  0x9c   : > { %s2388_s24 = scalar_lea.vmem [#allocation8], %s1591_s14  ;;  %s2390_s25 = scalar_lea.vmem [#allocation9], %s1591_s14 }
  0x9d   : > { %2052 = dma.done.wait (%p4568_p7), %s319_s15, 2048  }
  0x9e   : > { %2054 = vsyncadd (%p4568_p7), %s319_s15, 4294965248  ;;  %s1593_s9 = sshll.u32 %s2073_s19, 1  ;;  %p1595_p5 = scmp.ne.s32.totalorder %s2069_s18, 0 }
  0x9f   : > { %p371_p10 = scmp.lt.s32.totalorder %s1593_s9, 3  ;;  %v2096_v0 = vmov (!%p1595_p5), 0.0  }
  0xa0   : > { %379 = sbr.rel (%p1595_p5) target bundleno = 167 (0xa7), region = 56  ;;  %380 = vst [vmem:[#allocation2] sm:$0xff] (!%p1595_p5), %v2096_v0  ;;  %381 = vst [vmem:[#allocation2 + $0x8] sm:$0xff] (!%p1595_p5), %v2096_v0 }
  0xa1   : > { %s5128_s9 = smov (!%p371_p10, %s1593_s9), 3  ;;  %382 = vst [vmem:[#allocation3] sm:$0xff] (!%p1595_p5), %v2096_v0  ;;  %383 = vst [vmem:[#allocation3 + $0x8] sm:$0xff] (!%p1595_p5), %v2096_v0 }
  0xa2   : > { %s1594_s8 = sshll.u32 %s5128_s9, 3 }
  0xa3   : > { %s2400_s30 = scalar_lea.vmem %s4385_s4, %s1594_s8 }
  0xa7 PF: > { %v416_v1 = vld [vmem:[%s2382_s21] sm:$0xff]  ;;  %v417_v2 = vld [vmem:[%s2382_s21 + $0x8] sm:$0xff]  ;;  %v418_v3 = vld [vmem:[%s2382_s21 + $0x10] sm:$0xff]  ;;  %p1596_p8 = scmp.ne.s32.totalorder %s2069_s18, 1 }
  0xa8   : > { %v419_v4 = vld [vmem:[%s2382_s21 + $0x18] sm:$0xff]  ;;  %1695 = vlog2.f32 %v416_v1  ;;  %v420_v5 = vld [vmem:[%s2382_s21 + $0x20] sm:$0xff]  ;;  %v421_v6 = vld [vmem:[%s2382_s21 + $0x28] sm:$0xff] }
  0xa9   : > { %1697 = vlog2.f32 %v417_v2  ;;  %v422_v7 = vld [vmem:[%s2382_s21 + $0x30] sm:$0xff]  ;;  %v423_v8 = vld [vmem:[%s2382_s21 + $0x38] sm:$0xff]  ;;  %v424_v9 = vld [vmem:[%s2382_s21 + $0x40] sm:$0xff] }
  0xaa   : > { %1699 = vlog2.f32 %v418_v3  ;;  %v425_v10 = vld [vmem:[%s2382_s21 + $0x48] sm:$0xff]  ;;  %v426_v11 = vld [vmem:[%s2382_s21 + $0x50] sm:$0xff]  ;;  %v2415_v12 = vld [vmem:[%s2388_s24] sm:$0xff] }
  0xab   : > { %1701 = vlog2.f32 %v419_v4  ;;  %4570 = vst [vmem:[#allocation17_spill] sm:$0xff] %v2415_v12  ;;  %v2418_v13 = vld [vmem:[%s2388_s24 + $0x8] sm:$0xff]  ;;  %v2421_v14 = vld [vmem:[%s2388_s24 + $0x10] sm:$0xff]  ;;  %v2424_v15 = vld [vmem:[%s2388_s24 + $0x18] sm:$0xff]  ;;  %v4397_v22 = vunpack.c.l.bf16 %v2415_v12  ;;  %v4398_v23 = vunpack.c.h.bf16 %v2415_v12 }
  0xac   : > { %1703 = vlog2.f32 %v420_v5  ;;  %4571 = vst [vmem:[#allocation18_spill] sm:$0xff] %v2418_v13  ;;  %4572 = vst [vmem:[#allocation19_spill] sm:$0xff] %v2421_v14  ;;  %v2429_v17 = vld [vmem:[%s2388_s24 + $0x20] sm:$0xff]  ;;  %v2432_v18 = vld [vmem:[%s2388_s24 + $0x28] sm:$0xff]  ;;  %v4403_v24 = vunpack.c.l.bf16 %v2418_v13 }
  0xad   : > { %1705 = vlog2.f32 %v421_v6  ;;  %4573 = vst [vmem:[#allocation20_spill] sm:$0xff] %v2424_v15  ;;  %4574 = vst [vmem:[#allocation21_spill] sm:$0xff] %v2429_v17  ;;  %v2437_v20 = vld [vmem:[%s2388_s24 + $0x30] sm:$0xff]  ;;  %v2440_v21 = vld [vmem:[%s2388_s24 + $0x38] sm:$0xff] }
  0xae   : > { %1707 = vlog2.f32 %v422_v7  ;;  %4575 = vst [vmem:[#allocation22_spill] sm:$0xff] %v2432_v18  ;;  %4576 = vst [vmem:[#allocation23_spill] sm:$0xff] %v2437_v20  ;;  %v2449_v27 = vld [vmem:[%s2388_s24 + $0x40] sm:$0xff]  ;;  %v2452_v28 = vld [vmem:[%s2388_s24 + $0x48] sm:$0xff] }
  0xaf   : > { %1709 = vlog2.f32 %v423_v8  ;;  %4577 = vst [vmem:[#allocation24_spill] sm:$0xff] %v2440_v21  ;;  %4578 = vst [vmem:[#allocation25_spill] sm:$0xff] %v2449_v27  ;;  %v2461_v34 = vld [vmem:[%s2388_s24 + $0x50] sm:$0xff]  ;;  %v2464_v35 = vld [vmem:[%s2388_s24 + $0x58] sm:$0xff] }
  0xb0   : > { %1711 = vlog2.f32 %v424_v9  ;;  %4579 = vst [vmem:[#allocation26_spill] sm:$0xff] %v2452_v28  ;;  %4580 = vst [vmem:[#allocation27_spill] sm:$0xff] %v2461_v34  ;;  %v2473_v41 = vld [vmem:[%s2388_s24 + $0x60] sm:$0xff]  ;;  %v2476_v42 = vld [vmem:[%s2388_s24 + $0x68] sm:$0xff] }
  0xb1   : > { %1713 = vlog2.f32 %v425_v10  ;;  %4581 = vst [vmem:[#allocation28_spill] sm:$0xff] %v2464_v35  ;;  %4582 = vst [vmem:[#allocation29_spill] sm:$0xff] %v2473_v41  ;;  %v2485_v48 = vld [vmem:[%s2388_s24 + $0x70] sm:$0xff]  ;;  %v2488_v49 = vld [vmem:[%s2388_s24 + $0x78] sm:$0xff] }
  0xb2   : > { %v2426_v16 = vpop.eup %1695  ;;  %1715 = vlog2.f32 %v426_v11  ;;  %4583 = vst [vmem:[#allocation30_spill] sm:$0xff] %v2476_v42  ;;  %4584 = vst [vmem:[#allocation31_spill] sm:$0xff] %v2485_v48  ;;  %v427_v55 = vld [vmem:[%s2382_s21 + $0x58] sm:$0xff]  ;;  %v2502_v60 = vld [vmem:[%s2390_s25] sm:$0xff] }
  0xb3   : > { %v2434_v19 = vpop.eup %1697  ;;  %4585 = vst [vmem:[#allocation32_spill] sm:$0xff] %v2488_v49  ;;  %4586 = vst [vmem:[#allocation33_spill] sm:$0xff] %v2502_v60  ;;  %v2505_v61 = vld [vmem:[%s2390_s25 + $0x8] sm:$0xff]  ;;  %v428_v63 = vld [vmem:[%s2382_s21 + $0x60] sm:$0xff]  ;;  %1717 = vlog2.f32 %v427_v55 }
  0xb4   : > { %v2446_v26 = vpop.eup %1699  ;;  %4587 = vst [vmem:[#allocation34_spill] sm:$0xff] %v2505_v61  ;;  %v2515_v4 = vld [vmem:[%s2390_s25 + $0x10] sm:$0xff]  ;;  %v429_v6 = vld [vmem:[%s2382_s21 + $0x68] sm:$0xff]  ;;  %v2525_v11 = vld [vmem:[%s2390_s25 + $0x18] sm:$0xff]  ;;  %1719 = vlog2.f32 %v428_v63  ;;  %v4627_v61 = vunpack.c.h.bf16 %v2449_v27 }
  0xb5   : > { %v2458_v33 = vpop.eup %1701  ;;  %4588 = vst [vmem:[#allocation35_spill] sm:$0xff] %v2515_v4  ;;  %4589 = vst [vmem:[#allocation36_spill] sm:$0xff] %v2525_v11  ;;  %v2528_v2 = vld [vmem:[%s2390_s25 + $0x20] sm:$0xff]  ;;  %v430_v1 = vld [vmem:[%s2382_s21 + $0x70] sm:$0xff]  ;;  %1721 = vlog2.f32 %v429_v6 }
  0xb6   : > { %v2470_v40 = vpop.eup %1703  ;;  %4590 = vst [vmem:[#allocation37_spill] sm:$0xff] %v2528_v2  ;;  %v2534_v0 = vld [vmem:[%s2390_s25 + $0x28] sm:$0xff]  ;;  %v431_v9 = vld [vmem:[%s2382_s21 + $0x78] sm:$0xff]  ;;  %v2543_v58 = vld [vmem:[%s2390_s25 + $0x30] sm:$0xff]  ;;  %1723 = vlog2.f32 %v430_v1  ;;  %v2625_v31 = vmul.f32 0.6931472, %v2458_v33 }
  0xb7   : > { %v2482_v47 = vpop.eup %1705  ;;  %4591 = vst [vmem:[#allocation38_spill] sm:$0xff] %v2534_v0  ;;  %4592 = vst [vmem:[#allocation39_spill] sm:$0xff] %v2543_v58  ;;  %v2546_v57 = vld [vmem:[%s2390_s25 + $0x38] sm:$0xff]  ;;  %v432_v8 = vld [vmem:[%s2382_s21 + $0x80] sm:$0xff]  ;;  %1725 = vlog2.f32 %v431_v9  ;;  %v2629_v30 = vmul.f32 0.6931472, %v2470_v40 }
  0xb8   : > { %v2494_v54 = vpop.eup %1707  ;;  %4593 = vst [vmem:[#allocation40_spill] sm:$0xff] %v2546_v57  ;;  %v2553_v55 = vld [vmem:[%s2390_s25 + $0x40] sm:$0xff]  ;;  %v433_v56 = vld [vmem:[%s2382_s21 + $0x88] sm:$0xff]  ;;  %v2563_v50 = vld [vmem:[%s2390_s25 + $0x50] sm:$0xff]  ;;  %1727 = vlog2.f32 %v432_v8  ;;  %v2619_v8 = vmul.f32 0.6931472, %v2434_v19 }
  0xb9   : > { %v2507_v62 = vpop.eup %1709  ;;  %4594 = vst [vmem:[#allocation41_spill] sm:$0xff] %v2553_v55  ;;  %v2560_v53 = vld [vmem:[%s2390_s25 + $0x48] sm:$0xff]  ;;  %4596 = vst [vmem:[#allocation43_spill] sm:$0xff] %v2563_v50  ;;  %v434_v52 = vld [vmem:[%s2382_s21 + $0x90] sm:$0xff]  ;;  %1729 = vlog2.f32 %v433_v56  ;;  %v4628_v55 = vunpack.c.l.bf16 %v2452_v28 }
  0xba   : > { %v2517_v5 = vpop.eup %1711  ;;  %4595 = vst [vmem:[#allocation42_spill] sm:$0xff] %v2560_v53  ;;  %v2570_v46 = vld [vmem:[%s2390_s25 + $0x58] sm:$0xff]  ;;  %v2577_v44 = vld [vmem:[%s2390_s25 + $0x60] sm:$0xff]  ;;  %v2580_v59 = vld [vmem:[%s2390_s25 + $0x68] sm:$0xff]  ;;  %1731 = vlog2.f32 %v434_v52  ;;  %v2639_v29 = vmul.f32 0.6931472, %v2507_v62 }
  0xbb   : > { %v2530_v3 = vpop.eup %1713  ;;  %4597 = vst [vmem:[#allocation44_spill] sm:$0xff] %v2570_v46  ;;  %v435_v63 = vld [vmem:[%s2382_s21 + $0x98] sm:$0xff]  ;;  %4598 = vst [vmem:[#allocation45_spill] sm:$0xff] %v2577_v44  ;;  %v436_v6 = vld [vmem:[%s2382_s21 + $0xa0] sm:$0xff]  ;;  %v2642_v33 = vmul.f32 0.6931472, %v2517_v5  ;;  %v4613_v5 = vunpack.c.h.bf16 %v2418_v13  ;;  %v4621_v44 = vunpack.c.h.bf16 %v2432_v18 }
  0xbc   : > { %v2539_v10 = vpop.eup %1715  ;;  %4599 = vst [vmem:[#allocation46_spill] sm:$0xff] %v2580_v59  ;;  %v2587_v51 = vld [vmem:[%s2390_s25 + $0x70] sm:$0xff]  ;;  %v437_v38 = vld [vmem:[%s2382_s21 + $0xa8] sm:$0xff]  ;;  %v2594_v37 = vld [vmem:[%s2390_s25 + $0x78] sm:$0xff]  ;;  %1733 = vlog2.f32 %v435_v63  ;;  %v2615_v63 = vmul.f32 0.6931472, %v2426_v16 }
  0xbd   : > { %4600 = vst [vmem:[#allocation47_spill] sm:$0xff] %v2587_v51  ;;  %4601 = vst [vmem:[#allocation48_spill] sm:$0xff] %v2594_v37  ;;  %v438_v1 = vld [vmem:[%s2382_s21 + $0xb0] sm:$0xff]  ;;  %v439_v39 = vld [vmem:[%s2382_s21 + $0xb8] sm:$0xff]  ;;  %1735 = vlog2.f32 %v436_v6  ;;  %v2607_v43 = vpop.eup %1717  ;;  %v2622_v6 = vmul.f32 0.6931472, %v2446_v26 }
  0xbe   : > { %v440_v52 = vld [vmem:[%s2382_s21 + $0xc0] sm:$0xff]  ;;  %v441_v32 = vld [vmem:[%s2382_s21 + $0xc8] sm:$0xff]  ;;  %v442_v45 = vld [vmem:[%s2382_s21 + $0xd0] sm:$0xff]  ;;  %4602 = vst [vmem:[#allocation49_spill] sm:$0xff] %v2615_v63  ;;  %1737 = vlog2.f32 %v437_v38  ;;  %v1720_v36 = vpop.eup %1719  ;;  %v2632_v16 = vmul.f32 0.6931472, %v2482_v47 }
  0xbf   : > { %v443_v7 = vld [vmem:[%s2382_s21 + $0xd8] sm:$0xff]  ;;  %4603 = vst [vmem:[#allocation50_spill] sm:$0xff] %v2619_v8  ;;  %4604 = vst [vmem:[#allocation51_spill] sm:$0xff] %v2622_v6  ;;  %1739 = vlog2.f32 %v438_v1  ;;  %v1722_v9 = vpop.eup %1721  ;;  %v444_v56 = vld [vmem:[%s2382_s21 + $0xe0] sm:$0xff]  ;;  %v2635_v38 = vmul.f32 0.6931472, %v2494_v54 }
  0xc0   : > { %4605 = vst [vmem:[#allocation52_spill] sm:$0xff] %v2625_v31  ;;  %4606 = vst [vmem:[#allocation53_spill] sm:$0xff] %v2629_v30  ;;  %1741 = vlog2.f32 %v439_v39  ;;  %v1724_v19 = vpop.eup %1723  ;;  %v445_v26 = vld [vmem:[%s2382_s21 + $0xe8] sm:$0xff]  ;;  %v2645_v1 = vmul.f32 0.6931472, %v2530_v3  ;;  %v446_v25 = vld [vmem:[%s2382_s21 + $0xf0] sm:$0xff] }
  0xc1   : > { %4607 = vst [vmem:[#allocation54_spill] sm:$0xff] %v2632_v16  ;;  %4608 = vst [vmem:[#allocation55_spill] sm:$0xff] %v2635_v38  ;;  %1743 = vlog2.f32 %v440_v52  ;;  %v1726_v40 = vpop.eup %1725  ;;  %v2649_v47 = vmul.f32 0.6931472, %v2539_v10  ;;  %v2653_v39 = vmul.f32 0.1, %v4397_v22 }
  0xc2   : > { %4609 = vst [vmem:[#allocation56_spill] sm:$0xff] %v2639_v29  ;;  %4610 = vst [vmem:[#allocation57_spill] sm:$0xff] %v2642_v33  ;;  %1745 = vlog2.f32 %v441_v32  ;;  %v2657_v54 = vmul.f32 0.1, %v4398_v23  ;;  %v1728_v62 = vpop.eup %1727  ;;  %v2661_v3 = vmul.f32 0.1, %v4403_v24  ;;  %v4614_v32 = vunpack.c.l.bf16 %v2421_v14 }
  0xc3   : > { %4611 = vst [vmem:[#allocation58_spill] sm:$0xff] %v2645_v1  ;;  %4612 = vst [vmem:[#allocation59_spill] sm:$0xff] %v2649_v47  ;;  %1747 = vlog2.f32 %v442_v45  ;;  %v2665_v52 = vmul.f32 0.1, %v4613_v5  ;;  %v1730_v22 = vpop.eup %1729  ;;  %v4615_v23 = vunpack.c.h.bf16 %v2421_v14  ;;  %v4616_v45 = vunpack.c.l.bf16 %v2424_v15  ;;  %v447_v11 = vld [vmem:[%s2382_s21 + $0xf8] sm:$0xff] }
  0xc4   : > { %v2669_v10 = vmul.f32 0.1, %v4614_v32  ;;  %1749 = vlog2.f32 %v443_v7  ;;  %v4617_v24 = vunpack.c.h.bf16 %v2424_v15  ;;  %v1732_v5 = vpop.eup %1731  ;;  %v4618_v32 = vunpack.c.l.bf16 %v2429_v17 }
  0xc5   : > { %v2673_v37 = vmul.f32 0.1, %v4615_v23  ;;  %v2677_v57 = vmul.f32 0.1, %v4616_v45  ;;  %1751 = vlog2.f32 %v444_v56  ;;  %v4619_v7 = vunpack.c.h.bf16 %v2429_v17 }
  0xc6   : > { %v2681_v51 = vmul.f32 0.1, %v4617_v24  ;;  %v2685_v58 = vmul.f32 0.1, %v4618_v32  ;;  %v4620_v23 = vunpack.c.l.bf16 %v2432_v18  ;;  %v1734_v45 = vpop.eup %1733  ;;  %1753 = vlog2.f32 %v445_v26 }
  0xc7   : > { %v2689_v59 = vmul.f32 0.1, %v4619_v7  ;;  %v2697_v24 = vmul.f32 0.1, %v4621_v44  ;;  %v4622_v56 = vunpack.c.l.bf16 %v2437_v20  ;;  %v4623_v32 = vunpack.c.h.bf16 %v2437_v20  ;;  %v1736_v7 = vpop.eup %1735 }
  0xc8   : > { %v2693_v0 = vmul.f32 0.1, %v4620_v23  ;;  %1755 = vlog2.f32 %v446_v25  ;;  %v4624_v23 = vunpack.c.l.bf16 %v2440_v21  ;;  %v4625_v26 = vunpack.c.h.bf16 %v2440_v21 }
  0xc9   : > { %v2701_v2 = vmul.f32 0.1, %v4622_v56  ;;  %v2705_v46 = vmul.f32 0.1, %v4623_v32  ;;  %v4626_v44 = vunpack.c.l.bf16 %v2449_v27  ;;  %v1738_v56 = vpop.eup %1737  ;;  %v2722_v32 = vmul.f32 0.1, %v4627_v61 }
  0xca   : > { %v2710_v50 = vmul.f32 0.1, %v4624_v23  ;;  %v2714_v4 = vmul.f32 0.1, %v4625_v26  ;;  %v2726_v25 = vmul.f32 0.1, %v4628_v55  ;;  %v4629_v23 = vunpack.c.h.bf16 %v2452_v28  ;;  %v1740_v26 = vpop.eup %1739 }
  0xcb   : > { %v2718_v53 = vmul.f32 0.1, %v4626_v44  ;;  %1757 = vrsqrt.f32 %v2653_v39  ;;  %v2734_v47 = vmul.f32 0.6931472, %v2607_v43  ;;  %v4631_v44 = vunpack.c.l.bf16 %v2461_v34  ;;  %v1742_v55 = vpop.eup %1741 }
  0xcc   : > { %v2730_v60 = vmul.f32 0.1, %v4629_v23  ;;  %v4632_v61 = vunpack.c.h.bf16 %v2461_v34  ;;  %1759 = vrsqrt.f32 %v2657_v54  ;;  %v2745_v29 = vmul.f32 0.6931472, %v1720_v36 }
  0xcd   : > { %4630 = vst [vmem:[#allocation60_spill] sm:$0xff] %v2734_v47  ;;  %v2738_v1 = vmul.f32 0.1, %v4631_v44  ;;  %v4634_v23 = vunpack.c.l.bf16 %v2464_v35  ;;  %v4635_v43 = vunpack.c.h.bf16 %v2464_v35  ;;  %1761 = vrsqrt.f32 %v2661_v3  ;;  %v1744_v44 = vpop.eup %1743 }
  0xce   : > { %v2742_v33 = vmul.f32 0.1, %v4632_v61  ;;  %4633 = vst [vmem:[#allocation61_spill] sm:$0xff] %v2745_v29  ;;  %v2756_v16 = vmul.f32 0.6931472, %v1722_v9  ;;  %v4637_v61 = vunpack.c.l.bf16 %v2473_v41  ;;  %v4638_v36 = vunpack.c.h.bf16 %v2473_v41 }
  0xcf   : > { %v2749_v38 = vmul.f32 0.1, %v4634_v23  ;;  %v2753_v47 = vmul.f32 0.1, %v4635_v43  ;;  %1763 = vrsqrt.f32 %v2665_v52  ;;  %v1746_v23 = vpop.eup %1745  ;;  %v2767_v31 = vmul.f32 0.6931472, %v1724_v19 }
  0xd0   : > { %4636 = vst [vmem:[#allocation62_spill] sm:$0xff] %v2756_v16  ;;  %v2760_v30 = vmul.f32 0.1, %v4637_v61  ;;  %v2764_v29 = vmul.f32 0.1, %v4638_v36  ;;  %1765 = vlog2.f32 %v447_v11  ;;  %v4640_v43 = vunpack.c.l.bf16 %v2476_v42  ;;  %v1748_v61 = vpop.eup %1747 }
  0xd1   : > { %4639 = vst [vmem:[#allocation63_spill] sm:$0xff] %v2767_v31  ;;  %v4641_v9 = vunpack.c.h.bf16 %v2476_v42  ;;  %v2777_v8 = vmul.f32 0.6931472, %v1726_v40  ;;  %v4643_v36 = vunpack.c.l.bf16 %v2485_v48  ;;  %v4644_v41 = vunpack.c.h.bf16 %v2485_v48  ;;  %v1750_v11 = vpop.eup %1749 }
  0xd2   : > { %v2771_v6 = vmul.f32 0.1, %v4640_v43  ;;  %1767 = vrsqrt.f32 %v2669_v10  ;;  %v2788_v43 = vmul.f32 0.6931472, %v1728_v62  ;;  %v4646_v31 = vunpack.c.l.bf16 %v2488_v49 }
  0xd3   : > { %v2775_v16 = vmul.f32 0.1, %v4641_v9  ;;  %4642 = vst [vmem:[#allocation64_spill] sm:$0xff] %v2777_v8  ;;  %v2781_v63 = vmul.f32 0.1, %v4643_v36  ;;  %v4647_v40 = vunpack.c.h.bf16 %v2488_v49  ;;  %1769 = vrsqrt.f32 %v2673_v37  ;;  %v1752_v36 = vpop.eup %1751 }
  0xd4   : > { %v2785_v19 = vmul.f32 0.1, %v4644_v41  ;;  %4645 = vst [vmem:[#allocation65_spill] sm:$0xff] %v2788_v43  ;;  %v2792_v9 = vmul.f32 0.1, %v4646_v31  ;;  %vm642_vm0 = vcmp.eq.f32.partialorder %v2653_v39, inf  ;;  %1771 = vrsqrt.f32 %v2677_v57  ;;  %v1754_v62 = vpop.eup %1753 }
  0xd5   : > { %v2796_v8 = vmul.f32 0.1, %v4647_v40  ;;  %v2799_v42 = vmul.f32 0.6931472, %v1730_v22  ;;  %v2804_v43 = vmul.f32 0.6931472, %v1732_v5  ;;  %1773 = vrsqrt.f32 %v2681_v51  ;;  %v1756_v49 = vpop.eup %1755 }
  0xd6   : > { %v2806_v31 = vmul.f32 0.6931472, %v1734_v45  ;;  %vm649_vm1 = vcmp.eq.f32.partialorder %v2657_v54, inf  ;;  %v2811_v22 = vmul.f32 0.6931472, %v1736_v7  ;;  %vm656_vm2 = vcmp.eq.f32.partialorder %v2661_v3, inf  ;;  %v1758_v5 = vpop.eup %1757 }
  0xd7   : > { %4648 = vst [vmem:[#allocation66_spill] sm:$0xff] %v2799_v42  ;;  %4649 = vst [vmem:[#allocation67_spill] sm:$0xff] %v2804_v43  ;;  %vm663_vm3 = vcmp.eq.f32.partialorder %v2665_v52, inf  ;;  %1775 = vrsqrt.f32 %v2685_v58  ;;  %v2817_v45 = vmul.f32 0.6931472, %v1738_v56  ;;  %vm644_vm4 = vcmp.eq.f32.partialorder %v2653_v39, 0.0  ;;  %v1760_v7 = vpop.eup %1759 }
  0xd8   : > { %4650 = vst [vmem:[#allocation68_spill] sm:$0xff] %v2806_v31  ;;  %4651 = vst [vmem:[#allocation69_spill] sm:$0xff] %v2811_v22  ;;  %v2819_v31 = vmul.f32 0.6931472, %v1740_v26  ;;  %1777 = vrsqrt.f32 %v2689_v59  ;;  %v2824_v22 = vmul.f32 0.6931472, %v1742_v55  ;;  %v1762_v56 = vpop.eup %1761 }
  0xd9   : > { %4652 = vst [vmem:[#allocation70_spill] sm:$0xff] %v2817_v45  ;;  %vm651_vm5 = vcmp.eq.f32.partialorder %v2657_v54, 0.0  ;;  %vm670_vm6 = vcmp.eq.f32.partialorder %v2669_v10, inf  ;;  %1779 = vrsqrt.f32 %v2693_v0  ;;  %v2830_v26 = vmul.f32 0.6931472, %v1744_v44  ;;  %v1764_v40 = vpop.eup %1763 }
  0xda   : > { %4653 = vst [vmem:[#allocation71_spill] sm:$0xff] %v2819_v31  ;;  %4654 = vst [vmem:[#allocation72_spill] sm:$0xff] %v2824_v22  ;;  %v2832_v31 = vmul.f32 0.6931472, %v1746_v23  ;;  %vm658_vm7 = vcmp.eq.f32.partialorder %v2661_v3, 0.0  ;;  %vm665_vm8 = vcmp.eq.f32.partialorder %v2665_v52, 0.0  ;;  %1781 = vrsqrt.f32 %v2697_v24  ;;  %v1766_v23 = vpop.eup %1765 }
  0xdb   : > { %4655 = vst [vmem:[#allocation73_spill] sm:$0xff] %v2830_v26  ;;  %v2838_v22 = vmul.f32 0.6931472, %v1748_v61  ;;  %vm677_vm9 = vcmp.eq.f32.partialorder %v2673_v37, inf  ;;  %vm684_vm10 = vcmp.eq.f32.partialorder %v2677_v57, inf  ;;  %1783 = vrsqrt.f32 %v2701_v2 }
  0xdc   : > { %4656 = vst [vmem:[#allocation74_spill] sm:$0xff] %v2832_v31  ;;  %v2844_v41 = vmul.f32 0.6931472, %v1750_v11  ;;  %v641_v31 = vmul.f32 %v1758_v5, %v2653_v39  ;;  %vm672_vm11 = vcmp.eq.f32.partialorder %v2669_v10, 0.0  ;;  %v1768_v55 = vpop.eup %1767  ;;  %v648_v26 = vmul.f32 %v1760_v7, %v2657_v54 }
  0xdd   : > { %4657 = vst [vmem:[#allocation75_spill] sm:$0xff] %v2838_v22  ;;  %v2850_v22 = vmul.f32 0.6931472, %v1752_v36  ;;  %1785 = vrsqrt.f32 %v2705_v46  ;;  %v1770_v44 = vpop.eup %1769  ;;  %v2855_v11 = vmul.f32 0.6931472, %v1754_v62  ;;  %v655_v5 = vmul.f32 %v1762_v56, %v2661_v3 }
  0xde   : > { %4658 = vst [vmem:[#allocation76_spill] sm:$0xff] %v2844_v41  ;;  %v662_v41 = vmul.f32 %v1764_v40, %v2665_v52  ;;  %v1772_v61 = vpop.eup %1771  ;;  %v2864_v7 = vmul.f32 0.6931472, %v1766_v23  ;;  %v643_v40 = vsel %vm642_vm0, %v2653_v39, %v641_v31  ;;  %vm700_vm15 = vcmp.eq.f32.partialorder %v2685_v58, 0.0 }
  0xdf   : > { %4659 = vst [vmem:[#allocation77_spill] sm:$0xff] %v2850_v22  ;;  %4660 = vst [vmem:[#allocation78_spill] sm:$0xff] %v2855_v11  ;;  %v2862_v22 = vmul.f32 0.6931472, %v1756_v49  ;;  %v1774_v56 = vpop.eup %1773  ;;  %v669_v11 = vmul.f32 %v1768_v55, %v2669_v10  ;;  %vm712_vm14 = vcmp.eq.f32.partialorder %v2693_v0, inf  ;;  %1787 = vrsqrt.f32 %v2710_v50 }
  0xe0   : > { %4662 = vst [vmem:[#allocation80_spill] sm:$0xff] %v2864_v7  ;;  %v650_v23 = vsel %vm649_vm1, %v2657_v54, %v648_v26  ;;  %vm707_vm13 = vcmp.eq.f32.partialorder %v2689_v59, 0.0  ;;  %v715_v62 = vand.u32 2147483648, %v2693_v0  ;;  %vm719_vm12 = vcmp.eq.f32.partialorder %v2697_v24, inf }
  0xe1   : > { %4661 = vst [vmem:[#allocation79_spill] sm:$0xff] %v2862_v22  ;;  %v1776_v49 = vpop.eup %1775  ;;  %v722_v31 = vand.u32 2147483648, %v2697_v24  ;;  %v657_v36 = vsel %vm656_vm2, %v2661_v3, %v655_v5  ;;  %v664_v7 = vsel %vm663_vm3, %v2665_v52, %v662_v41  ;;  %v676_v22 = vmul.f32 %v1770_v44, %v2673_v37 }
  0xe2   : > { %v1778_v55 = vpop.eup %1777  ;;  %v683_v26 = vmul.f32 %v1772_v61, %v2677_v57  ;;  %vm714_vm0 = vcmp.eq.f32.partialorder %v2693_v0, 0.0  ;;  %v4663_v43 = vand.u32 2147483648, %v2653_v39  ;;  %v690_v48 = vmul.f32 %v1774_v56, %v2681_v51 }
  0xe3   : > { %v1780_v45 = vpop.eup %1779  ;;  %vm721_vm1 = vcmp.eq.f32.partialorder %v2697_v24, 0.0  ;;  %vm726_vm2 = vcmp.eq.f32.partialorder %v2701_v2, inf  ;;  %1789 = vrsqrt.f32 %v2714_v4  ;;  %v4664_v44 = vand.u32 2147483648, %v2657_v54 }
  0xe4   : > { %v2896_v42 = vsel %vm644_vm4, %v4663_v43, %v643_v40  ;;  %v1782_v41 = vpop.eup %1781  ;;  %v671_v39 = vsel %vm670_vm6, %v2669_v10, %v669_v11  ;;  %v697_v43 = vmul.f32 %v1776_v49, %v2685_v58  ;;  %vm728_vm3 = vcmp.eq.f32.partialorder %v2701_v2, 0.0 }
  0xe5   : > { %v2906_v61 = vsel %vm651_vm5, %v4664_v44, %v650_v23  ;;  %v729_v5 = vand.u32 2147483648, %v2701_v2  ;;  %v1784_v56 = vpop.eup %1783  ;;  %v4665_v40 = vand.u32 2147483648, %v2661_v3  ;;  %v4666_v54 = vand.u32 2147483648, %v2665_v52 }
  0xe6   : > { %v704_v11 = vmul.f32 %v1778_v55, %v2689_v59  ;;  %vm733_vm4 = vcmp.eq.f32.partialorder %v2705_v46, inf  ;;  %v678_v49 = vsel %vm677_vm9, %v2673_v37, %v676_v22  ;;  %v685_v3 = vsel %vm684_vm10, %v2677_v57, %v683_v26 }
  0xe7   : > { %v2918_v35 = vsel %vm658_vm7, %v4665_v40, %v657_v36  ;;  %v2924_v23 = vsel %vm665_vm8, %v4666_v54, %v664_v7  ;;  %v711_v36 = vmul.f32 %v1780_v45, %v2693_v0  ;;  %vm735_vm5 = vcmp.eq.f32.partialorder %v2705_v46, 0.0  ;;  %v1786_v52 = vpop.eup %1785 }
  0xe8   : > { %1791 = vrsqrt.f32 %v2718_v53  ;;  %v4667_v7 = vand.u32 2147483648, %v2669_v10  ;;  %vm4668_vm6 = vcmp.eq.f32.partialorder %v2681_v51, inf  ;;  %v718_v44 = vmul.f32 %v1782_v41, %v2697_v24 }
  0xe9   : > { %v692_v22 = vsel %vm4668_vm6, %v2681_v51, %v690_v48  ;;  %1793 = vrsqrt.f32 %v2722_v32  ;;  %vm4669_vm7 = vcmp.eq.f32.partialorder %v2685_v58, inf  ;;  %v725_v26 = vmul.f32 %v1784_v56, %v2701_v2  ;;  %v1788_v56 = vpop.eup %1787 }
  0xea   : > { %v2941_v55 = vsel %vm672_vm11, %v4667_v7, %v671_v39  ;;  %v699_v45 = vsel %vm4669_vm7, %v2685_v58, %v697_v43  ;;  %v736_v40 = vand.u32 2147483648, %v2705_v46  ;;  %1795 = vrsqrt.f32 %v2726_v25 }
  0xeb   : > { %v4670_v10 = vand.u32 2147483648, %v2673_v37  ;;  %vm4671_vm8 = vcmp.eq.f32.partialorder %v2673_v37, 0.0  ;;  %v4672_v48 = vand.u32 2147483648, %v2677_v57  ;;  %vm4673_vm9 = vcmp.eq.f32.partialorder %v2677_v57, 0.0 }
  0xec   : > { %vm4674_vm10 = vcmp.eq.f32.partialorder %v2689_v59, inf  ;;  %1797 = vrsqrt.f32 %v2730_v60  ;;  %v4675_v54 = vand.u32 2147483648, %v2681_v51  ;;  %vm4676_vm11 = vcmp.eq.f32.partialorder %v2681_v51, 0.0 }
  0xed   : > { %v2958_v39 = vsel %vm4671_vm8, %v4670_v10, %v678_v49  ;;  %v2964_v41 = vsel %vm4673_vm9, %v4672_v48, %v685_v3  ;;  %v706_v43 = vsel %vm4674_vm10, %v2689_v59, %v704_v11  ;;  %v713_v49 = vsel %vm712_vm14, %v2693_v0, %v711_v36 }
  0xee   : > { %v2974_v37 = vsel %vm4676_vm11, %v4675_v54, %v692_v22  ;;  %v732_v57 = vmul.f32 %v1786_v52, %v2705_v46  ;;  %vm740_vm6 = vcmp.eq.f32.partialorder %v2710_v50, inf  ;;  %v4677_v3 = vand.u32 2147483648, %v2685_v58  ;;  %v1790_v22 = vpop.eup %1789 }
  0xef   : > { %v720_v51 = vsel %vm719_vm12, %v2697_v24, %v718_v44  ;;  %vm742_vm7 = vcmp.eq.f32.partialorder %v2710_v50, 0.0  ;;  %1799 = vrsqrt.f32 %v2738_v1  ;;  %v4678_v36 = vand.u32 2147483648, %v2689_v59 }
  0xf0   : > { %v2985_v11 = vsel %vm700_vm15, %v4677_v3, %v699_v45  ;;  %v727_v58 = vsel %vm726_vm2, %v2701_v2, %v725_v26  ;;  %v743_v7 = vand.u32 2147483648, %v2710_v50  ;;  %1801 = vrsqrt.f32 %v2742_v33 }
  0xf1   : > { %v2996_v52 = vsel %vm707_vm13, %v4678_v36, %v706_v43  ;;  %v3005_v44 = vsel %vm714_vm0, %v715_v62, %v713_v49  ;;  %v739_v45 = vmul.f32 %v1788_v56, %v2710_v50  ;;  %vm747_vm12 = vcmp.eq.f32.partialorder %v2714_v4, inf }
  0xf2   : > { %1803 = vrsqrt.f32 %v2749_v38  ;;  %v3012_v59 = vsel %vm721_vm1, %v722_v31, %v720_v51  ;;  %v734_v26 = vsel %vm733_vm4, %v2705_v46, %v732_v57  ;;  %vm749_vm13 = vcmp.eq.f32.partialorder %v2714_v4, 0.0  ;;  %v1792_v24 = vpop.eup %1791 }
  0xf3   : > { %1805 = vrsqrt.f32 %v2753_v47  ;;  %v3021_v0 = vsel %vm728_vm3, %v729_v5, %v727_v58  ;;  %v750_v62 = vand.u32 2147483648, %v2714_v4  ;;  %vm754_vm14 = vcmp.eq.f32.partialorder %v2718_v53, inf  ;;  %v1794_v2 = vpop.eup %1793 }
  0xf4   : > { %1807 = vrsqrt.f32 %v2760_v30  ;;  %v746_v31 = vmul.f32 %v1790_v22, %v2714_v4  ;;  %vm756_vm15 = vcmp.eq.f32.partialorder %v2718_v53, 0.0  ;;  %v757_v10 = vand.u32 2147483648, %v2718_v53  ;;  %v1796_v56 = vpop.eup %1795 }
  0xf5   : > { %vm761_vm0 = vcmp.eq.f32.partialorder %v2722_v32, inf  ;;  %v764_v48 = vand.u32 2147483648, %v2722_v32  ;;  %v3033_v5 = vsel %vm735_vm5, %v736_v40, %v734_v26  ;;  %v741_v43 = vsel %vm740_vm6, %v2710_v50, %v739_v45 }
  0xf6   : > { %4679 = vst [vmem:[#allocation81_spill] sm:$0xff] %v3033_v5  ;;  %vm763_vm1 = vcmp.eq.f32.partialorder %v2722_v32, 0.0  ;;  %vm768_vm2 = vcmp.eq.f32.partialorder %v2726_v25, inf  ;;  %1809 = vrsqrt.f32 %v2764_v29  ;;  %vm770_vm3 = vcmp.eq.f32.partialorder %v2726_v25, 0.0  ;;  %v1798_v40 = vpop.eup %1797 }
  0xf7   : > { %v771_v54 = vand.u32 2147483648, %v2726_v25  ;;  %vm775_vm4 = vcmp.eq.f32.partialorder %v2730_v60, inf  ;;  %vm777_vm5 = vcmp.eq.f32.partialorder %v2730_v60, 0.0  ;;  %v778_v46 = vand.u32 2147483648, %v2730_v60 }
  0xf8   : > { %vm782_vm8 = vcmp.eq.f32.partialorder %v2738_v1, inf  ;;  %vm789_vm9 = vcmp.eq.f32.partialorder %v2742_v33, inf  ;;  %1811 = vrsqrt.f32 %v2771_v6  ;;  %v3052_v57 = vsel %vm742_vm7, %v743_v7, %v741_v43 }
  0xf9   : > { %4680 = vst [vmem:[#allocation82_spill] sm:$0xff] %v3052_v57  ;;  %v748_v3 = vsel %vm747_vm12, %v2714_v4, %v746_v31  ;;  %v753_v51 = vmul.f32 %v1792_v24, %v2718_v53  ;;  %v1800_v58 = vpop.eup %1799  ;;  %v760_v22 = vmul.f32 %v1794_v2, %v2722_v32  ;;  %v767_v45 = vmul.f32 %v1796_v56, %v2726_v25 }
  0xfa   : > { %1813 = vrsqrt.f32 %v2775_v16  ;;  %v1802_v50 = vpop.eup %1801  ;;  %v774_v7 = vmul.f32 %v1798_v40, %v2730_v60  ;;  %v799_v26 = vand.u32 2147483648, %v2749_v38  ;;  %vm803_vm12 = vcmp.eq.f32.partialorder %v2753_v47, inf }
  0xfb   : > { %1815 = vrsqrt.f32 %v2781_v63  ;;  %v3072_v31 = vsel %vm749_vm13, %v750_v62, %v748_v3  ;;  %vm805_vm10 = vcmp.eq.f32.partialorder %v2753_v47, 0.0  ;;  %v806_v2 = vand.u32 2147483648, %v2753_v47 }
  0xfc   : > { %v1804_v24 = vpop.eup %1803  ;;  %vm810_vm11 = vcmp.eq.f32.partialorder %v2760_v30, inf  ;;  %v755_v56 = vsel %vm754_vm14, %v2718_v53, %v753_v51  ;;  %vm812_vm7 = vcmp.eq.f32.partialorder %v2760_v30, 0.0  ;;  %v813_v40 = vand.u32 2147483648, %v2760_v30 }
  0xfd   : > { %v1806_v43 = vpop.eup %1805  ;;  %vm817_vm6 = vcmp.eq.f32.partialorder %v2764_v29, inf  ;;  %v820_v4 = vand.u32 2147483648, %v2764_v29  ;;  %v762_v3 = vsel %vm761_vm0, %v2722_v32, %v760_v22  ;;  %v769_v36 = vsel %vm768_vm2, %v2726_v25, %v767_v45 }
  0xfe   : > { %v1808_v62 = vpop.eup %1807  ;;  %v781_v49 = vmul.f32 %v1800_v58, %v2738_v1  ;;  %1817 = vrsqrt.f32 %v2785_v19  ;;  %v776_v51 = vsel %vm775_vm4, %v2730_v60, %v774_v7  ;;  %v788_v34 = vmul.f32 %v1802_v50, %v2742_v33 }
  0xff   : > { %v795_v28 = vmul.f32 %v1804_v24, %v2749_v38  ;;  %vm819_vm13 = vcmp.eq.f32.partialorder %v2764_v29, 0.0  ;;  %1819 = vrsqrt.f32 %v2792_v9  ;;  %v3101_v45 = vsel %vm756_vm15, %v757_v10, %v755_v56 }
 0x100   : > { %v1810_v22 = vpop.eup %1809  ;;  %v802_v58 = vmul.f32 %v1806_v43, %v2753_v47  ;;  %vm824_vm14 = vcmp.eq.f32.partialorder %v2771_v6, inf  ;;  %1821 = vrsqrt.f32 %v2796_v8  ;;  %v3108_v50 = vsel %vm763_vm1, %v764_v48, %v762_v3 }
 0x101   : > { %v809_v7 = vmul.f32 %v1808_v62, %v2760_v30  ;;  %vm826_vm0 = vcmp.eq.f32.partialorder %v2771_v6, 0.0  ;;  %v827_v24 = vand.u32 2147483648, %v2771_v6  ;;  %vm831_vm2 = vcmp.eq.f32.partialorder %v2775_v16, inf }
 0x102   : > { %v1812_v53 = vpop.eup %1811  ;;  %v3116_v10 = vsel %vm770_vm3, %v771_v54, %v769_v36  ;;  %v3120_v43 = vsel %vm777_vm5, %v778_v46, %v776_v51  ;;  %v783_v32 = vsel %vm782_vm8, %v2738_v1, %v781_v49  ;;  %v834_v48 = vand.u32 2147483648, %v2775_v16 }
 0x103   : > { %v790_v56 = vsel %vm789_vm9, %v2742_v33, %v788_v34  ;;  %vm4681_vm15 = vcmp.eq.f32.partialorder %v2749_v38, inf  ;;  %v816_v54 = vmul.f32 %v1810_v22, %v2764_v29  ;;  %vm833_vm1 = vcmp.eq.f32.partialorder %v2775_v16, 0.0 }
 0x104   : > { %v797_v25 = vsel %vm4681_vm15, %v2749_v38, %v795_v28  ;;  %1823 = vrsqrt.f32 %v2896_v42  ;;  %v1814_v60 = vpop.eup %1813  ;;  %v804_v46 = vsel %vm803_vm12, %v2753_v47, %v802_v58  ;;  %vm838_vm3 = vcmp.eq.f32.partialorder %v2781_v63, inf }
 0x105   : > { %vm840_vm4 = vcmp.eq.f32.partialorder %v2781_v63, 0.0  ;;  %1825 = vrsqrt.f32 %v2906_v61  ;;  %v1816_v34 = vpop.eup %1815  ;;  %v4682_v28 = vand.u32 2147483648, %v2738_v1  ;;  %vm4683_vm5 = vcmp.eq.f32.partialorder %v2738_v1, 0.0 }
 0x106   : > { %v811_v36 = vsel %vm810_vm11, %v2760_v30, %v809_v7  ;;  %v823_v62 = vmul.f32 %v1812_v53, %v2771_v6  ;;  %v841_v3 = vand.u32 2147483648, %v2781_v63  ;;  %v4684_v51 = vand.u32 2147483648, %v2742_v33 }
 0x107   : > { %v3145_v49 = vsel %vm4683_vm5, %v4682_v28, %v783_v32  ;;  %vm4685_vm8 = vcmp.eq.f32.partialorder %v2742_v33, 0.0  ;;  %vm4687_vm9 = vcmp.eq.f32.partialorder %v2749_v38, 0.0  ;;  %vm845_vm12 = vcmp.eq.f32.partialorder %v2785_v19, inf }
 0x108   : > { %v3156_v22 = vsel %vm4685_vm8, %v4684_v51, %v790_v56  ;;  %v3160_v58 = vsel %vm4687_vm9, %v799_v26, %v797_v25  ;;  %1827 = vrsqrt.f32 %v2918_v35  ;;  %v3166_v1 = vsel %vm805_vm10, %v806_v2, %v804_v46  ;;  %v1818_v38 = vpop.eup %1817 }
 0x109   : > { %4686 = vst [vmem:[#allocation83_spill] sm:$0xff] %v3156_v22  ;;  %4688 = vst [vmem:[#allocation84_spill] sm:$0xff] %v3160_v58  ;;  %v818_v7 = vsel %vm817_vm6, %v2764_v29, %v816_v54  ;;  %v830_v33 = vmul.f32 %v1814_v60, %v2775_v16  ;;  %vm847_vm11 = vcmp.eq.f32.partialorder %v2785_v19, 0.0  ;;  %1829 = vrsqrt.f32 %v2924_v23  ;;  %v1820_v2 = vpop.eup %1819 }
 0x10a   : > { %4689 = vst [vmem:[#allocation85_spill] sm:$0xff] %v3166_v1  ;;  %v3176_v26 = vsel %vm812_vm7, %v813_v40, %v811_v36  ;;  %v837_v53 = vmul.f32 %v1816_v34, %v2781_v63  ;;  %v848_v47 = vand.u32 2147483648, %v2785_v19  ;;  %1831 = vrsqrt.f32 %v2941_v55  ;;  %v1822_v30 = vpop.eup %1821 }
 0x10b   : > { %4690 = vst [vmem:[#allocation86_spill] sm:$0xff] %v3176_v26  ;;  %v825_v32 = vsel %vm824_vm14, %v2771_v6, %v823_v62  ;;  %vm852_vm10 = vcmp.eq.f32.partialorder %v2792_v9, inf  ;;  %vm854_vm6 = vcmp.eq.f32.partialorder %v2792_v9, 0.0  ;;  %1833 = vrsqrt.f32 %v2958_v39 }
 0x10c   : > { %v3189_v40 = vsel %vm819_vm13, %v820_v4, %v818_v7  ;;  %v855_v56 = vand.u32 2147483648, %v2792_v9  ;;  %vm859_vm7 = vcmp.eq.f32.partialorder %v2796_v8, inf  ;;  %vm861_vm15 = vcmp.eq.f32.partialorder %v2796_v8, 0.0 }
 0x10d   : > { %v832_v25 = vsel %vm831_vm2, %v2775_v16, %v830_v33  ;;  %v844_v54 = vmul.f32 %v1818_v38, %v2785_v19  ;;  %v862_v60 = vand.u32 2147483648, %v2796_v8  ;;  %vm866_vm14 = vcmp.eq.f32.partialorder %v2896_v42, inf }
 0x10e   : > { %v3202_v29 = vsel %vm826_vm0, %v827_v24, %v825_v32  ;;  %v839_v4 = vsel %vm838_vm3, %v2781_v63, %v837_v53  ;;  %v851_v46 = vmul.f32 %v1820_v2, %v2792_v9  ;;  %1835 = vrsqrt.f32 %v2964_v41  ;;  %v1824_v34 = vpop.eup %1823 }
 0x10f   : > { %v858_v28 = vmul.f32 %v1822_v30, %v2796_v8  ;;  %vm868_vm13 = vcmp.eq.f32.partialorder %v2896_v42, 0.0  ;;  %v869_v36 = vand.u32 2147483648, %v2896_v42  ;;  %vm873_vm2 = vcmp.eq.f32.partialorder %v2906_v61, inf  ;;  %v1826_v6 = vpop.eup %1825 }
 0x110   : > { %1837 = vrsqrt.f32 %v2974_v37  ;;  %v3216_v24 = vsel %vm833_vm1, %v834_v48, %v832_v25  ;;  %vm875_vm0 = vcmp.eq.f32.partialorder %v2906_v61, 0.0  ;;  %v876_v62 = vand.u32 2147483648, %v2906_v61 }
 0x111   : > { %1839 = vrsqrt.f32 %v2985_v11  ;;  %v3223_v51 = vsel %vm840_vm4, %v841_v3, %v839_v4  ;;  %v846_v7 = vsel %vm845_vm12, %v2785_v19, %v844_v54  ;;  %vm880_vm3 = vcmp.eq.f32.partialorder %v2918_v35, inf }
 0x112   : > { %v883_v16 = vand.u32 2147483648, %v2918_v35  ;;  %v1828_v48 = vpop.eup %1827  ;;  %v853_v33 = vsel %vm852_vm10, %v2792_v9, %v851_v46  ;;  %vm882_vm1 = vcmp.eq.f32.partialorder %v2918_v35, 0.0  ;;  %vm887_vm5 = vcmp.eq.f32.partialorder %v2924_v23, inf }
 0x113   : > { %v890_v63 = vand.u32 2147483648, %v2924_v23  ;;  %vm894_vm4 = vcmp.eq.f32.partialorder %v2941_v55, inf  ;;  %v1830_v3 = vpop.eup %1829  ;;  %v860_v38 = vsel %vm859_vm7, %v2796_v8, %v858_v28  ;;  %v865_v53 = vmul.f32 %v1824_v34, %v2896_v42 }
 0x114   : > { %v872_v2 = vmul.f32 %v1826_v6, %v2906_v61  ;;  %vm889_vm8 = vcmp.eq.f32.partialorder %v2924_v23, 0.0  ;;  %1841 = vrsqrt.f32 %v2996_v52  ;;  %v1832_v32 = vpop.eup %1831  ;;  %v3246_v30 = vsel %vm847_vm11, %v848_v47, %v846_v7 }
 0x115   : > { %vm896_vm9 = vcmp.eq.f32.partialorder %v2941_v55, 0.0  ;;  %v897_v25 = vand.u32 2147483648, %v2941_v55  ;;  %vm901_vm12 = vcmp.eq.f32.partialorder %v2958_v39, inf  ;;  %1843 = vrsqrt.f32 %v3005_v44  ;;  %v1834_v54 = vpop.eup %1833 }
 0x116   : > { %vm903_vm10 = vcmp.eq.f32.partialorder %v2958_v39, 0.0  ;;  %v904_v4 = vand.u32 2147483648, %v2958_v39  ;;  %vm908_vm7 = vcmp.eq.f32.partialorder %v2964_v41, inf  ;;  %v911_v46 = vand.u32 2147483648, %v2964_v41 }
 0x117   : > { %v3258_v19 = vsel %vm854_vm6, %v855_v56, %v853_v33  ;;  %v3262_v47 = vsel %vm861_vm15, %v862_v60, %v860_v38  ;;  %v879_v34 = vmul.f32 %v1828_v48, %v2918_v35  ;;  %vm915_vm11 = vcmp.eq.f32.partialorder %v2974_v37, inf }
 0x118   : > { %v867_v28 = vsel %vm866_vm14, %v2896_v42, %v865_v53  ;;  %v874_v6 = vsel %vm873_vm2, %v2906_v61, %v872_v2  ;;  %v886_v9 = vmul.f32 %v1830_v3, %v2924_v23  ;;  %vm910_vm6 = vcmp.eq.f32.partialorder %v2964_v41, 0.0  ;;  %v1836_v8 = vpop.eup %1835 }
 0x119   : > { %1845 = vrsqrt.f32 %v3012_v59  ;;  %v893_v56 = vmul.f32 %v1832_v32, %v2941_v55  ;;  %v900_v60 = vmul.f32 %v1834_v54, %v2958_v39  ;;  %v918_v7 = vand.u32 2147483648, %v2974_v37 }
 0x11a   : > { %1847 = vrsqrt.f32 %v3021_v0  ;;  %v1838_v48 = vpop.eup %1837  ;;  %vm922_vm14 = vcmp.eq.f32.partialorder %v2985_v11, inf  ;;  %vm924_vm2 = vcmp.eq.f32.partialorder %v2985_v11, 0.0  ;;  %v925_v33 = vand.u32 2147483648, %v2985_v11 }
 0x11b   : > { %1849 = vrsqrt.f32 %v3033_v5  ;;  %v1840_v3 = vpop.eup %1839  ;;  %v3286_v38 = vsel %vm868_vm13, %v869_v36, %v867_v28  ;;  %v3290_v53 = vsel %vm875_vm0, %v876_v62, %v874_v6  ;;  %v881_v2 = vsel %vm880_vm3, %v2918_v35, %v879_v34 }
 0x11c   : > { %vm929_vm15 = vcmp.eq.f32.partialorder %v2996_v52, inf  ;;  %v888_v32 = vsel %vm887_vm5, %v2924_v23, %v886_v9  ;;  %v907_v54 = vmul.f32 %v1836_v8, %v2964_v41  ;;  %v932_v27 = vand.u32 2147483648, %v2996_v52 }
 0x11d   : > { %1851 = vrsqrt.f32 %v3052_v57  ;;  %v895_v36 = vsel %vm894_vm4, %v2941_v55, %v893_v56  ;;  %v902_v62 = vsel %vm901_vm12, %v2958_v39, %v900_v60  ;;  %v914_v34 = vmul.f32 %v1838_v48, %v2974_v37 }
 0x11e   : > { %vm931_vm13 = vcmp.eq.f32.partialorder %v2996_v52, 0.0  ;;  %vm936_vm0 = vcmp.eq.f32.partialorder %v3005_v44, inf  ;;  %v1842_v28 = vpop.eup %1841  ;;  %v3313_v6 = vsel %vm882_vm1, %v883_v16, %v881_v2  ;;  %v921_v9 = vmul.f32 %v1840_v3, %v2985_v11 }
 0x11f   : > { %vm938_vm3 = vcmp.eq.f32.partialorder %v3005_v44, 0.0  ;;  %1853 = vrsqrt.f32 %v3072_v31  ;;  %v1844_v8 = vpop.eup %1843  ;;  %v3320_v56 = vsel %vm889_vm8, %v890_v63, %v888_v32  ;;  %v939_v60 = vand.u32 2147483648, %v3005_v44 }
 0x120   : > { %vm943_vm5 = vcmp.eq.f32.partialorder %v3012_v59, inf  ;;  %v946_v48 = vand.u32 2147483648, %v3012_v59  ;;  %v3327_v16 = vsel %vm896_vm9, %v897_v25, %v895_v36  ;;  %v3331_v3 = vsel %vm903_vm10, %v904_v4, %v902_v62 }
 0x121   : > { %v909_v2 = vsel %vm908_vm7, %v2964_v41, %v907_v54  ;;  %1855 = vrsqrt.f32 %v3101_v45  ;;  %v916_v63 = vsel %vm915_vm11, %v2974_v37, %v914_v34  ;;  %v928_v32 = vmul.f32 %v1842_v28, %v2996_v52 }
 0x122   : > { %vm945_vm1 = vcmp.eq.f32.partialorder %v3012_v59, 0.0  ;;  %vm950_vm4 = vcmp.eq.f32.partialorder %v3021_v0, inf  ;;  %1857 = vrsqrt.f32 %v3108_v50  ;;  %v923_v4 = vsel %vm922_vm14, %v2985_v11, %v921_v9 }
 0x123   : > { %v1846_v25 = vpop.eup %1845  ;;  %v935_v54 = vmul.f32 %v1844_v8, %v3005_v44  ;;  %vm952_vm8 = vcmp.eq.f32.partialorder %v3021_v0, 0.0  ;;  %1859 = vrsqrt.f32 %v3116_v10  ;;  %v3352_v62 = vsel %vm910_vm6, %v911_v46, %v909_v2 }
 0x124   : > { %v1848_v36 = vpop.eup %1847  ;;  %v953_v34 = vand.u32 2147483648, %v3021_v0  ;;  %vm957_vm9 = vcmp.eq.f32.partialorder %v3033_v5, inf  ;;  %vm959_vm12 = vcmp.eq.f32.partialorder %v3033_v5, 0.0  ;;  %vm4691_vm10 = vcmp.eq.f32.partialorder %v2974_v37, 0.0 }
 0x125   : > { %v1850_v28 = vpop.eup %1849  ;;  %v3359_v9 = vsel %vm4691_vm10, %v918_v7, %v916_v63  ;;  %v960_v8 = vand.u32 2147483648, %v3033_v5  ;;  %vm964_vm7 = vcmp.eq.f32.partialorder %v3052_v57, inf  ;;  %v967_v21 = vand.u32 2147483648, %v3052_v57 }
 0x126   : > { %v3366_v46 = vsel %vm924_vm2, %v925_v33, %v923_v4  ;;  %v930_v2 = vsel %vm929_vm15, %v2996_v52, %v928_v32  ;;  %v942_v20 = vmul.f32 %v1846_v25, %v3012_v59  ;;  %vm966_vm11 = vcmp.eq.f32.partialorder %v3052_v57, 0.0 }
 0x127   : > { %1861 = vrsqrt.f32 %v3120_v43  ;;  %v1852_v7 = vpop.eup %1851  ;;  %v937_v63 = vsel %vm936_vm0, %v3005_v44, %v935_v54  ;;  %v949_v18 = vmul.f32 %v1848_v36, %v3021_v0  ;;  %vm971_vm6 = vcmp.eq.f32.partialorder %v3072_v31, inf }
 0x128   : > { %1863 = vrsqrt.f32 %v3145_v49  ;;  %v956_v33 = vmul.f32 %v1850_v28, %v3033_v5  ;;  %vm973_vm15 = vcmp.eq.f32.partialorder %v3072_v31, 0.0  ;;  %v974_v32 = vand.u32 2147483648, %v3072_v31 }
 0x129   : > { %1865 = vrsqrt.f32 %v3156_v22  ;;  %v1854_v25 = vpop.eup %1853  ;;  %v3386_v4 = vsel %vm931_vm13, %v932_v27, %v930_v2  ;;  %vm978_vm14 = vcmp.eq.f32.partialorder %v3101_v45, inf  ;;  %v981_v54 = vand.u32 2147483648, %v3101_v45 }
 0x12a   : > { %1867 = vrsqrt.f32 %v3160_v58  ;;  %v3393_v36 = vsel %vm938_vm3, %v939_v60, %v937_v63  ;;  %v944_v28 = vsel %vm943_vm5, %v3012_v59, %v942_v20  ;;  %v963_v17 = vmul.f32 %v1852_v7, %v3052_v57 }
 0x12b   : > { %vm980_vm2 = vcmp.eq.f32.partialorder %v3101_v45, 0.0  ;;  %vm985_vm13 = vcmp.eq.f32.partialorder %v3108_v50, inf  ;;  %v1856_v27 = vpop.eup %1855  ;;  %v951_v2 = vsel %vm950_vm4, %v3021_v0, %v949_v18  ;;  %v988_v15 = vand.u32 2147483648, %v3108_v50 }
 0x12c   : > { %vm992_vm0 = vcmp.eq.f32.partialorder %v3116_v10, inf  ;;  %1869 = vrsqrt.f32 %v3166_v1  ;;  %v1858_v60 = vpop.eup %1857  ;;  %v958_v20 = vsel %vm957_vm9, %v3033_v5, %v956_v33  ;;  %v970_v7 = vmul.f32 %v1854_v25, %v3072_v31 }
 0x12d   : > { %vm987_vm3 = vcmp.eq.f32.partialorder %v3108_v50, 0.0  ;;  %vm994_vm5 = vcmp.eq.f32.partialorder %v3116_v10, 0.0  ;;  %1871 = vrsqrt.f32 %v3176_v26  ;;  %v1860_v18 = vpop.eup %1859  ;;  %v3416_v63 = vsel %vm945_vm1, %v946_v48, %v944_v28 }
 0x12e   : > { %v995_v14 = vand.u32 2147483648, %v3116_v10  ;;  %vm999_vm4 = vcmp.eq.f32.partialorder %v3120_v43, inf  ;;  %1873 = vrsqrt.f32 %v3189_v40  ;;  %v3423_v33 = vsel %vm952_vm8, %v953_v34, %v951_v2 }
 0x12f   : > { %4692 = vst [vmem:[#allocation87_spill] sm:$0xff] %v3423_v33  ;;  %v965_v25 = vsel %vm964_vm7, %v3052_v57, %v963_v17  ;;  %v977_v13 = vmul.f32 %v1856_v27, %v3101_v45  ;;  %v1002_v12 = vand.u32 2147483648, %v3120_v43  ;;  %v3432_v48 = vsel %vm959_vm12, %v960_v8, %v958_v20 }
 0x130   : > { %4693 = vst [vmem:[#allocation88_spill] sm:$0xff] %v3432_v48  ;;  %vm1001_vm1 = vcmp.eq.f32.partialorder %v3120_v43, 0.0  ;;  %vm1006_vm9 = vcmp.eq.f32.partialorder %v3145_v49, inf  ;;  %v1009_v28 = vand.u32 2147483648, %v3145_v49  ;;  %vm1013_vm8 = vcmp.eq.f32.partialorder %v3156_v22, inf }
 0x131   : > { %v1862_v34 = vpop.eup %1861  ;;  %v972_v17 = vsel %vm971_vm6, %v3072_v31, %v970_v7  ;;  %v984_v27 = vmul.f32 %v1858_v60, %v3108_v50  ;;  %v991_v2 = vmul.f32 %v1860_v18, %v3116_v10  ;;  %1875 = vrsqrt.f32 %v3202_v29 }
 0x132   : > { %v1864_v8 = vpop.eup %1863  ;;  %v3447_v20 = vsel %vm966_vm11, %v967_v21, %v965_v25  ;;  %vm1015_vm10 = vcmp.eq.f32.partialorder %v3156_v22, 0.0  ;;  %v1016_v48 = vand.u32 2147483648, %v3156_v22  ;;  %vm1020_vm7 = vcmp.eq.f32.partialorder %v3160_v58, inf }
 0x133   : > { %4694 = vst [vmem:[#allocation89_spill] sm:$0xff] %v3447_v20  ;;  %v1866_v7 = vpop.eup %1865  ;;  %v979_v60 = vsel %vm978_vm14, %v3101_v45, %v977_v13  ;;  %vm1022_vm6 = vcmp.eq.f32.partialorder %v3160_v58, 0.0  ;;  %v1023_v18 = vand.u32 2147483648, %v3160_v58  ;;  %vm1027_vm12 = vcmp.eq.f32.partialorder %v3166_v1, inf }
 0x134   : > { %1877 = vrsqrt.f32 %v3216_v24  ;;  %v1868_v21 = vpop.eup %1867  ;;  %v3461_v25 = vsel %vm973_vm15, %v974_v32, %v972_v17  ;;  %v998_v20 = vmul.f32 %v1862_v34, %v3120_v43  ;;  %v1030_v57 = vand.u32 2147483648, %v3166_v1 }
 0x135   : > { %4695 = vst [vmem:[#allocation90_spill] sm:$0xff] %v3461_v25  ;;  %1879 = vrsqrt.f32 %v3223_v51  ;;  %v986_v13 = vsel %vm985_vm13, %v3108_v50, %v984_v27  ;;  %v993_v5 = vsel %vm992_vm0, %v3116_v10, %v991_v2  ;;  %v1005_v33 = vmul.f32 %v1864_v8, %v3145_v49 }
 0x136   : > { %vm1029_vm11 = vcmp.eq.f32.partialorder %v3166_v1, 0.0  ;;  %1881 = vrsqrt.f32 %v3246_v30  ;;  %v1870_v32 = vpop.eup %1869  ;;  %v3477_v34 = vsel %vm980_vm2, %v981_v54, %v979_v60  ;;  %v1012_v17 = vmul.f32 %v1866_v7, %v3156_v22 }
 0x137   : > { %4696 = vst [vmem:[#allocation91_spill] sm:$0xff] %v3477_v34  ;;  %vm1034_vm15 = vcmp.eq.f32.partialorder %v3176_v26, inf  ;;  %1883 = vrsqrt.f32 %v3258_v19  ;;  %v1872_v27 = vpop.eup %1871  ;;  %v1019_v2 = vmul.f32 %v1868_v21, %v3160_v58  ;;  %vm1036_vm14 = vcmp.eq.f32.partialorder %v3176_v26, 0.0 }
 0x138   : > { %v1037_v8 = vand.u32 2147483648, %v3176_v26  ;;  %1885 = vrsqrt.f32 %v3262_v47  ;;  %v1874_v25 = vpop.eup %1873  ;;  %v3488_v54 = vsel %vm987_vm3, %v988_v15, %v986_v13  ;;  %v3492_v7 = vsel %vm994_vm5, %v995_v14, %v993_v5 }
 0x139   : > { %4697 = vst [vmem:[#allocation92_spill] sm:$0xff] %v3492_v7  ;;  %v1000_v60 = vsel %vm999_vm4, %v3120_v43, %v998_v20  ;;  %vm1041_vm2 = vcmp.eq.f32.partialorder %v3189_v40, inf  ;;  %v1007_v21 = vsel %vm1006_vm9, %v3145_v49, %v1005_v33  ;;  %v1026_v34 = vmul.f32 %v1870_v32, %v3166_v1 }
 0x13a   : > { %vm1043_vm13 = vcmp.eq.f32.partialorder %v3189_v40, 0.0  ;;  %v1044_v15 = vand.u32 2147483648, %v3189_v40  ;;  %v1014_v14 = vsel %vm1013_vm8, %v3156_v22, %v1012_v17  ;;  %v1033_v5 = vmul.f32 %v1872_v27, %v3176_v26 }
 0x13b   : > { %vm1048_vm0 = vcmp.eq.f32.partialorder %v3202_v29, inf  ;;  %vm1050_vm3 = vcmp.eq.f32.partialorder %v3202_v29, 0.0  ;;  %v1876_v20 = vpop.eup %1875  ;;  %v3512_v33 = vsel %vm1001_vm1, %v1002_v12, %v1000_v60  ;;  %v1021_v13 = vsel %vm1020_vm7, %v3160_v58, %v1019_v2 }
 0x13c   : > { %v1040_v32 = vmul.f32 %v1874_v25, %v3189_v40  ;;  %v1051_v7 = vand.u32 2147483648, %v3202_v29  ;;  %vm4698_vm5 = vcmp.eq.f32.partialorder %v3145_v49, 0.0  ;;  %vm1055_vm4 = vcmp.eq.f32.partialorder %v3216_v24, inf }
 0x13d   : > { %v3521_v17 = vsel %vm4698_vm5, %v1009_v28, %v1007_v21  ;;  %vm1057_vm9 = vcmp.eq.f32.partialorder %v3216_v24, 0.0  ;;  %v1058_v27 = vand.u32 2147483648, %v3216_v24  ;;  %v3528_v60 = vsel %vm1015_vm10, %v1016_v48, %v1014_v14 }
 0x13e   : > { %4699 = vst [vmem:[#allocation93_spill] sm:$0xff] %v3521_v17  ;;  %v1878_v12 = vpop.eup %1877  ;;  %4700 = vst [vmem:[#allocation94_spill] sm:$0xff] %v3528_v60  ;;  %v1028_v25 = vsel %vm1027_vm12, %v3166_v1, %v1026_v34  ;;  %vm1062_vm1 = vcmp.eq.f32.partialorder %v3223_v51, inf  ;;  %v1065_v28 = vand.u32 2147483648, %v3223_v51  ;;  %v1024_v21 = vsel %vm1022_vm6, %v1023_v18, %v1021_v13 }
 0x13f   : > { %v1880_v2 = vpop.eup %1879  ;;  %v1035_v17 = vsel %vm1034_vm15, %v3176_v26, %v1033_v5  ;;  %v1047_v22 = vmul.f32 %v1876_v20, %v3202_v29  ;;  %vm1064_vm8 = vcmp.eq.f32.partialorder %v3223_v51, 0.0  ;;  %vm1069_vm10 = vcmp.eq.f32.partialorder %v3246_v30, inf }
 0x140   : > { %v1882_v48 = vpop.eup %1881  ;;  %v1042_v34 = vsel %vm1041_vm2, %v3189_v40, %v1040_v32  ;;  %vm1071_vm12 = vcmp.eq.f32.partialorder %v3246_v30, 0.0  ;;  %v1072_v14 = vand.u32 2147483648, %v3246_v30  ;;  %vm1076_vm7 = vcmp.eq.f32.partialorder %v3258_v19, inf }
 0x141   : > { %v1884_v18 = vpop.eup %1883  ;;  %v1031_v5 = vsel %vm1029_vm11, %v1030_v57, %v1028_v25  ;;  %v1054_v20 = vmul.f32 %v1878_v12, %v3216_v24  ;;  %vm1078_vm6 = vcmp.eq.f32.partialorder %v3258_v19, 0.0  ;;  %v1079_v13 = vand.u32 2147483648, %v3258_v19 }
 0x142   : > { %v1886_v58 = vpop.eup %1885  ;;  %v1038_v32 = vsel %vm1036_vm14, %v1037_v8, %v1035_v17  ;;  %vm1083_vm15 = vcmp.eq.f32.partialorder %v3262_v47, inf  ;;  %vm1085_vm2 = vcmp.eq.f32.partialorder %v3262_v47, 0.0  ;;  %v1086_v60 = vand.u32 2147483648, %v3262_v47 }
 0x143   : > { %v1045_v1 = vsel %vm1043_vm13, %v1044_v15, %v1042_v34  ;;  %v1049_v57 = vsel %vm1048_vm0, %v3202_v29, %v1047_v22  ;;  %v1061_v12 = vmul.f32 %v1880_v2, %v3223_v51  ;;  %v3567_v25 = vmul.f32 %v3286_v38, %v2896_v42 }
 0x144   : > { %v1068_v8 = vmul.f32 %v1882_v48, %v3246_v30  ;;  %v1075_v17 = vmul.f32 %v1884_v18, %v3258_v19  ;;  %v3573_v26 = vmul.f32 %v3290_v53, %v2906_v61  ;;  %v3577_v15 = vmul.f32 %v3313_v6, %v2918_v35 }
 0x145   : > { %v1056_v22 = vsel %vm1055_vm4, %v3216_v24, %v1054_v20  ;;  %v1082_v2 = vmul.f32 %v1886_v58, %v3262_v47  ;;  %v3585_v42 = vmul.f32 %v3320_v56, %v2924_v23  ;;  %v3589_v38 = vmul.f32 %v3327_v16, %v2941_v55 }
 0x146   : > { %v1052_v61 = vsel %vm1050_vm3, %v1051_v7, %v1049_v57  ;;  %v3595_v35 = vmul.f32 %v3331_v3, %v2958_v39  ;;  %v3599_v53 = vmul.f32 %v3352_v62, %v2964_v41  ;;  %v3603_v58 = vmul.f32 %v3359_v9, %v2974_v37  ;;  %v4712_v3 = vld [vmem:[#allocation81_spill] sm:$0xff]  ;;  %v4713_v62 = vld [vmem:[#allocation88_spill] sm:$0xff]  ;;  %v4726_v57 = vld [vmem:[#allocation83_spill] sm:$0xff] }
 0x147   : > { %4701 = vst [vmem:[#allocation95_spill] sm:$0xff] %v3585_v42  ;;  %4702 = vst [vmem:[#allocation96_spill] sm:$0xff] %v3589_v38  ;;  %v1063_v23 = vsel %vm1062_vm1, %v3223_v51, %v1061_v12  ;;  %v3610_v55 = vmul.f32 %v3366_v46, %v2985_v11  ;;  %v3614_v39 = vmul.f32 %v3386_v4, %v2996_v52  ;;  %v4715_v46 = vld [vmem:[#allocation82_spill] sm:$0xff]  ;;  %v4716_v4 = vld [vmem:[#allocation89_spill] sm:$0xff] }
 0x148   : > { %4703 = vst [vmem:[#allocation97_spill] sm:$0xff] %v3595_v35  ;;  %4704 = vst [vmem:[#allocation98_spill] sm:$0xff] %v3599_v53  ;;  %v3618_v41 = vmul.f32 %v3393_v36, %v3005_v44  ;;  %v1059_v37 = vsel %vm1057_vm9, %v1058_v27, %v1056_v22  ;;  %v1070_v6 = vsel %vm1069_vm10, %v3246_v30, %v1068_v8  ;;  %v4710_v44 = vld [vmem:[#allocation87_spill] sm:$0xff]  ;;  %v4733_v22 = vld [vmem:[#allocation86_spill] sm:$0xff] }
 0x149   : > { %4705 = vst [vmem:[#allocation99_spill] sm:$0xff] %v3603_v58  ;;  %4706 = vst [vmem:[#allocation100_spill] sm:$0xff] %v3610_v55  ;;  %v1077_v11 = vsel %vm1076_vm7, %v3258_v19, %v1075_v17  ;;  %v3630_v56 = vmul.f32 %v3416_v63, %v3012_v59  ;;  %v1084_v52 = vsel %vm1083_vm15, %v3262_v47, %v1082_v2  ;;  %v4718_v63 = vld [vmem:[#allocation90_spill] sm:$0xff]  ;;  %v4720_v27 = vld [vmem:[#allocation91_spill] sm:$0xff] }
 0x14a   : > { %4707 = vst [vmem:[#allocation101_spill] sm:$0xff] %v3614_v39  ;;  %4708 = vst [vmem:[#allocation102_spill] sm:$0xff] %v3618_v41  ;;  %v3637_v16 = vmul.f32 %v4710_v44, %v3021_v0  ;;  %v3641_v9 = vmul.f32 %v4713_v62, %v4712_v3  ;;  %v3645_v36 = vmul.f32 %v4716_v4, %v4715_v46  ;;  %v4763_v44 = vmov 0  ;;  %v4766_v3 = vld [vmem:[#allocation20_spill] sm:$0xff]  ;;  %v386_v53 = vld [vmem:[%s2374_s11 + $0x10] sm:$0xff] }
 0x14b   : > { %4709 = vst [vmem:[#allocation103_spill] sm:$0xff] %v3630_v56  ;;  %v1066_v59 = vsel %vm1064_vm8, %v1065_v28, %v1063_v23  ;;  %v3651_v7 = vmul.f32 %v4718_v63, %v3072_v31  ;;  %v3655_v48 = vmul.f32 %v4720_v27, %v3101_v45  ;;  %v3659_v0 = vmul.f32 %v3488_v54, %v3108_v50  ;;  %v4721_v28 = vld [vmem:[#allocation92_spill] sm:$0xff]  ;;  %v4724_v50 = vld [vmem:[#allocation93_spill] sm:$0xff]  ;;  %v389_v39 = vld [vmem:[%s2374_s11 + $0x28] sm:$0xff] }
 0x14c   : > { %4711 = vst [vmem:[#allocation87_spill] sm:$0xff] %v3637_v16  ;;  %4714 = vst [vmem:[#allocation81_spill] sm:$0xff] %v3641_v9  ;;  %v1073_v34 = vsel %vm1071_vm12, %v1072_v14, %v1070_v6  ;;  %v1080_v18 = vsel %vm1078_vm6, %v1079_v13, %v1077_v11  ;;  %v3667_v20 = vmul.f32 %v4721_v28, %v3116_v10  ;;  %v4727_v14 = vld [vmem:[#allocation94_spill] sm:$0xff]  ;;  %v4729_v13 = vld [vmem:[#allocation84_spill] sm:$0xff]  ;;  %v4754_v23 = vmov 0 }
 0x14d   : > { %4717 = vst [vmem:[#allocation88_spill] sm:$0xff] %v3645_v36  ;;  %4719 = vst [vmem:[#allocation82_spill] sm:$0xff] %v3651_v7  ;;  %v3671_v31 = vmul.f32 %v3512_v33, %v3120_v43  ;;  %v1087_v45 = vsel %vm1085_vm2, %v1086_v60, %v1084_v52  ;;  %v3677_v54 = vmul.f32 %v4724_v50, %v3145_v49  ;;  %v4731_v10 = vld [vmem:[#allocation85_spill] sm:$0xff]  ;;  %v4759_v11 = vmov 0  ;;  %v387_v41 = vld [vmem:[%s2374_s11 + $0x18] sm:$0xff] }
 0x14e   : > { %4722 = vst [vmem:[#allocation89_spill] sm:$0xff] %v3667_v20  ;;  %v3681_v12 = vmul.f32 %v4727_v14, %v4726_v57  ;;  %v3684_v8 = vmul.f32 %v1024_v21, %v4729_v13  ;;  %v3687_v17 = vmul.f32 %v1031_v5, %v4731_v10  ;;  %v3690_v43 = vmul.f32 %v1038_v32, %v4733_v22  ;;  %v4775_v63 = vld [vmem:[#allocation21_spill] sm:$0xff]  ;;  %v4793_v10 = vld [vmem:[#allocation23_spill] sm:$0xff]  ;;  %v391_v36 = vld [vmem:[%s2374_s11 + $0x38] sm:$0xff] }
 0x14f   : > { %4723 = vst [vmem:[#allocation90_spill] sm:$0xff] %v3671_v31  ;;  %4725 = vst [vmem:[#allocation91_spill] sm:$0xff] %v3677_v54  ;;  %v3693_v33 = vmul.f32 %v1045_v1, %v3189_v40  ;;  %v3696_v60 = vmul.f32 %v1052_v61, %v3202_v29  ;;  %v3699_v49 = vmul.f32 %v1059_v37, %v3216_v24  ;;  %v4742_v1 = vld [vmem:[#allocation17_spill] sm:$0xff]  ;;  %v4757_v37 = vld [vmem:[#allocation19_spill] sm:$0xff]  ;;  %v4767_v62 = vunpack.c.l.bf16 %v4766_v3 }
 0x150   : > { %4728 = vst [vmem:[#allocation92_spill] sm:$0xff] %v3681_v12  ;;  %4730 = vst [vmem:[#allocation93_spill] sm:$0xff] %v3684_v8  ;;  %v3702_v2 = vmul.f32 %v1066_v59, %v3223_v51  ;;  %v3705_v21 = vmul.f32 %v1073_v34, %v3246_v30  ;;  %v3708_v5 = vmul.f32 %v1080_v18, %v3258_v19  ;;  %v4743_v40 = vunpack.c.l.bf16 %v4742_v1  ;;  %v4749_v30 = vld [vmem:[#allocation18_spill] sm:$0xff]  ;;  %v395_v7 = vld [vmem:[%s2374_s11 + $0x58] sm:$0xff] }
 0x151   : > { %4732 = vst [vmem:[#allocation83_spill] sm:$0xff] %v3687_v17  ;;  %4734 = vst [vmem:[#allocation94_spill] sm:$0xff] %v3690_v43  ;;  %v3711_v32 = vmul.f32 %v1087_v45, %v3262_v47  ;;  %v4746_v24 = vunpack.c.h.bf16 %v4742_v1  ;;  %v4750_v61 = vunpack.c.l.bf16 %v4749_v30  ;;  %v4753_v47 = vunpack.c.h.bf16 %v4749_v30  ;;  %v4784_v45 = vld [vmem:[#allocation22_spill] sm:$0xff]  ;;  %v4802_v30 = vld [vmem:[#allocation24_spill] sm:$0xff] }
 0x152   : > { %4735 = vst [vmem:[#allocation84_spill] sm:$0xff] %v3693_v33  ;;  %4736 = vst [vmem:[#allocation85_spill] sm:$0xff] %v3696_v60  ;;  %vm3715_vm11 = vcmp.ge.f32.partialorder %v4743_v40, 10.0  ;;  %v4758_v6 = vunpack.c.l.bf16 %v4757_v37  ;;  %v4762_v52 = vunpack.c.h.bf16 %v4757_v37  ;;  %vm3751_vm4 = vcmp.ge.f32.partialorder %v4767_v62, 10.0  ;;  %v393_v9 = vld [vmem:[%s2374_s11 + $0x48] sm:$0xff]  ;;  %v399_v56 = vld [vmem:[%s2374_s11 + $0x78] sm:$0xff] }
 0x153   : > { %4737 = vst [vmem:[#allocation86_spill] sm:$0xff] %v3699_v49  ;;  %4738 = vst [vmem:[#allocation104_spill] sm:$0xff] %v3702_v2  ;;  %vm3721_vm14 = vcmp.ge.f32.partialorder %v4746_v24, 10.0  ;;  %vm3727_vm13 = vcmp.ge.f32.partialorder %v4750_v61, 10.0  ;;  %vm3733_vm0 = vcmp.ge.f32.partialorder %v4753_v47, 10.0  ;;  %v4768_v46 = vmov 0 }
 0x154   : > { %4739 = vst [vmem:[#allocation105_spill] sm:$0xff] %v3705_v21  ;;  %4740 = vst [vmem:[#allocation106_spill] sm:$0xff] %v3708_v5  ;;  %v4755_v23 = vsel %vm3733_vm0, 4294967295, %v4754_v23  ;;  %vm3739_vm3 = vcmp.ge.f32.partialorder %v4758_v6, 10.0  ;;  %vm3745_vm5 = vcmp.ge.f32.partialorder %v4762_v52, 10.0  ;;  %v4769_v46 = vsel %vm3751_vm4, 4294967295, %v4768_v46 }
 0x155   : > { %4741 = vst [vmem:[#allocation107_spill] sm:$0xff] %v3711_v32  ;;  %4756 = vst [vmem:[#allocation17_spill] sm:$0xff] %v4755_v23  ;;  %v4760_v11 = vsel %vm3739_vm3, 4294967295, %v4759_v11  ;;  %v4764_v44 = vsel %vm3745_vm5, 4294967295, %v4763_v44  ;;  %v4771_v4 = vunpack.c.h.bf16 %v4766_v3  ;;  %v4772_v59 = vmov 0  ;;  %v4811_v52 = vld [vmem:[#allocation25_spill] sm:$0xff] }
 0x156   : > { %4761 = vst [vmem:[#allocation18_spill] sm:$0xff] %v4760_v11  ;;  %4765 = vst [vmem:[#allocation19_spill] sm:$0xff] %v4764_v44  ;;  %v4776_v27 = vunpack.c.l.bf16 %v4775_v63  ;;  %v4777_v34 = vmov 0  ;;  %v4780_v18 = vunpack.c.h.bf16 %v4775_v63  ;;  %v4781_v28 = vmov 0  ;;  %v4871_v2 = vld [vmem:[#allocation32_spill] sm:$0xff]  ;;  %v397_v16 = vld [vmem:[%s2374_s11 + $0x68] sm:$0xff] }
 0x157   : > { %4770 = vst [vmem:[#allocation20_spill] sm:$0xff] %v4769_v46  ;;  %vm3757_vm9 = vcmp.ge.f32.partialorder %v4771_v4, 10.0  ;;  %v4785_v50 = vunpack.c.l.bf16 %v4784_v45  ;;  %v4786_v57 = vmov 0  ;;  %v4789_v14 = vunpack.c.h.bf16 %v4784_v45  ;;  %v384_v46 = vld [vmem:[%s2374_s11] sm:$0xff]  ;;  %v4902_v55 = vld [vmem:[#allocation50_spill] sm:$0xff]  ;;  %v4904_v43 = vld [vmem:[#allocation52_spill] sm:$0xff] }
 0x158   : > { %v4773_v59 = vsel %vm3757_vm9, 4294967295, %v4772_v59  ;;  %vm3763_vm1 = vcmp.ge.f32.partialorder %v4776_v27, 10.0  ;;  %vm3769_vm8 = vcmp.ge.f32.partialorder %v4780_v18, 10.0  ;;  %v4790_v13 = vmov 0  ;;  %v4818_v27 = vld [vmem:[#allocation26_spill] sm:$0xff]  ;;  %v400_v60 = vld [vmem:[%s2374_s11 + $0x80] sm:$0xff] }
 0x159   : > { %4774 = vst [vmem:[#allocation108_spill] sm:$0xff] %v4773_v59  ;;  %v4778_v34 = vsel %vm3763_vm1, 4294967295, %v4777_v34  ;;  %v4782_v28 = vsel %vm3769_vm8, 4294967295, %v4781_v28  ;;  %vm3775_vm10 = vcmp.ge.f32.partialorder %v4785_v50, 10.0  ;;  %vm3781_vm12 = vcmp.ge.f32.partialorder %v4789_v14, 10.0  ;;  %v405_v33 = vld [vmem:[%s2374_s11 + $0xa8] sm:$0xff] }
 0x15a   : > { %4779 = vst [vmem:[#allocation21_spill] sm:$0xff] %v4778_v34  ;;  %4783 = vst [vmem:[#allocation109_spill] sm:$0xff] %v4782_v28  ;;  %v4787_v57 = vsel %vm3775_vm10, 4294967295, %v4786_v57  ;;  %v4791_v13 = vsel %vm3781_vm12, 4294967295, %v4790_v13  ;;  %v4794_v22 = vunpack.c.l.bf16 %v4793_v10  ;;  %v4795_v1 = vmov 0  ;;  %v4905_v34 = vld [vmem:[#allocation53_spill] sm:$0xff] }
 0x15b   : > { %4788 = vst [vmem:[#allocation22_spill] sm:$0xff] %v4787_v57  ;;  %4792 = vst [vmem:[#allocation110_spill] sm:$0xff] %v4791_v13  ;;  %v4798_v40 = vunpack.c.h.bf16 %v4793_v10  ;;  %v4799_v24 = vmov 0  ;;  %v4803_v61 = vunpack.c.l.bf16 %v4802_v30  ;;  %v4804_v47 = vmov 0  ;;  %v4826_v10 = vld [vmem:[#allocation27_spill] sm:$0xff]  ;;  %v388_v57 = vld [vmem:[%s2374_s11 + $0x20] sm:$0xff] }
 0x15c   : > { %vm3787_vm7 = vcmp.ge.f32.partialorder %v4794_v22, 10.0  ;;  %v4807_v37 = vunpack.c.h.bf16 %v4802_v30  ;;  %v4808_v6 = vmov 0  ;;  %v4812_v3 = vunpack.c.l.bf16 %v4811_v52  ;;  %v390_v13 = vld [vmem:[%s2374_s11 + $0x30] sm:$0xff]  ;;  %v4910_v59 = vld [vmem:[#allocation58_spill] sm:$0xff]  ;;  %v412_v54 = vld [vmem:[%s2374_s11 + $0xe0] sm:$0xff] }
 0x15d   : > { %v4796_v1 = vsel %vm3787_vm7, 4294967295, %v4795_v1  ;;  %vm3793_vm6 = vcmp.ge.f32.partialorder %v4798_v40, 10.0  ;;  %vm3799_vm15 = vcmp.ge.f32.partialorder %v4803_v61, 10.0  ;;  %v4813_v62 = vmov 0  ;;  %v4914_v12 = vld [vmem:[#allocation62_spill] sm:$0xff]  ;;  %v4915_v35 = vld [vmem:[#allocation63_spill] sm:$0xff] }
 0x15e   : > { %4797 = vst [vmem:[#allocation23_spill] sm:$0xff] %v4796_v1  ;;  %v4800_v24 = vsel %vm3793_vm6, 4294967295, %v4799_v24  ;;  %v4805_v47 = vsel %vm3799_vm15, 4294967295, %v4804_v47  ;;  %vm3805_vm2 = vcmp.ge.f32.partialorder %v4807_v37, 10.0  ;;  %vm3811_vm7 = vcmp.ge.f32.partialorder %v4812_v3, 10.0  ;;  %v4835_v37 = vld [vmem:[#allocation28_spill] sm:$0xff] }
 0x15f   : > { %4801 = vst [vmem:[#allocation111_spill] sm:$0xff] %v4800_v24  ;;  %4806 = vst [vmem:[#allocation24_spill] sm:$0xff] %v4805_v47  ;;  %v4809_v6 = vsel %vm3805_vm2, 4294967295, %v4808_v6  ;;  %v4814_v62 = vsel %vm3811_vm7, 4294967295, %v4813_v62  ;;  %v4815_v4 = vunpack.c.h.bf16 %v4811_v52  ;;  %v4816_v63 = vmov 0  ;;  %v392_v47 = vld [vmem:[%s2374_s11 + $0x40] sm:$0xff] }
 0x160   : > { %4810 = vst [vmem:[#allocation112_spill] sm:$0xff] %v4809_v6  ;;  %v4819_v18 = vunpack.c.l.bf16 %v4818_v27  ;;  %v4820_v45 = vmov 0  ;;  %v4822_v50 = vunpack.c.h.bf16 %v4818_v27  ;;  %v4823_v14 = vmov 0  ;;  %v394_v24 = vld [vmem:[%s2374_s11 + $0x50] sm:$0xff]  ;;  %v396_v6 = vld [vmem:[%s2374_s11 + $0x60] sm:$0xff]  ;;  %v415_v11 = vld [vmem:[%s2374_s11 + $0xf8] sm:$0xff] }
 0x161   : > { %vm3817_vm6 = vcmp.ge.f32.partialorder %v4815_v4, 10.0  ;;  %v4827_v22 = vunpack.c.l.bf16 %v4826_v10  ;;  %v4828_v40 = vmov 0  ;;  %v4831_v30 = vunpack.c.h.bf16 %v4826_v10  ;;  %v398_v1 = vld [vmem:[%s2374_s11 + $0x70] sm:$0xff]  ;;  %v4920_v31 = vld [vmem:[#allocation68_spill] sm:$0xff]  ;;  %v4925_v42 = vld [vmem:[#allocation73_spill] sm:$0xff] }
 0x162   : > { %v4817_v63 = vsel %vm3817_vm6, 4294967295, %v4816_v63  ;;  %vm3823_vm15 = vcmp.ge.f32.partialorder %v4819_v18, 10.0  ;;  %vm3829_vm2 = vcmp.ge.f32.partialorder %v4822_v50, 10.0  ;;  %v4832_v61 = vmov 0  ;;  %v4844_v18 = vld [vmem:[#allocation29_spill] sm:$0xff]  ;;  %v4930_v20 = vld [vmem:[#allocation78_spill] sm:$0xff] }
 0x163   : > { %v4821_v45 = vsel %vm3823_vm15, 4294967295, %v4820_v45  ;;  %v4824_v14 = vsel %vm3829_vm2, 4294967295, %v4823_v14  ;;  %vm3835_vm7 = vcmp.ge.f32.partialorder %v4827_v22, 10.0  ;;  %vm3841_vm6 = vcmp.ge.f32.partialorder %v4831_v30, 10.0 }
 0x164   : > { %4825 = vst [vmem:[#allocation25_spill] sm:$0xff] %v4824_v14  ;;  %v4829_v40 = vsel %vm3835_vm7, 4294967295, %v4828_v40  ;;  %v4833_v61 = vsel %vm3841_vm6, 4294967295, %v4832_v61  ;;  %v4836_v52 = vunpack.c.l.bf16 %v4835_v37  ;;  %v4837_v3 = vmov 0 }
 0x165   : > { %4830 = vst [vmem:[#allocation26_spill] sm:$0xff] %v4829_v40  ;;  %4834 = vst [vmem:[#allocation27_spill] sm:$0xff] %v4833_v61  ;;  %v4840_v4 = vunpack.c.h.bf16 %v4835_v37  ;;  %v4841_v27 = vmov 0  ;;  %v4845_v50 = vunpack.c.l.bf16 %v4844_v18  ;;  %v4846_v10 = vmov 0  ;;  %v4918_v40 = vld [vmem:[#allocation66_spill] sm:$0xff] }
 0x166   : > { %vm3847_vm15 = vcmp.ge.f32.partialorder %v4836_v52, 10.0  ;;  %v4849_v22 = vunpack.c.h.bf16 %v4844_v18  ;;  %v4850_v30 = vmov 0  ;;  %v4853_v52 = vld [vmem:[#allocation30_spill] sm:$0xff]  ;;  %v4855_v37 = vmov 0 }
 0x167   : > { %v4838_v3 = vsel %vm3847_vm15, 4294967295, %v4837_v3  ;;  %vm3853_vm2 = vcmp.ge.f32.partialorder %v4840_v4, 10.0  ;;  %vm3859_vm7 = vcmp.ge.f32.partialorder %v4845_v50, 10.0  ;;  %v4854_v32 = vunpack.c.l.bf16 %v4853_v52  ;;  %v4862_v50 = vld [vmem:[#allocation31_spill] sm:$0xff] }
 0x168   : > { %4839 = vst [vmem:[#allocation28_spill] sm:$0xff] %v4838_v3  ;;  %v4842_v27 = vsel %vm3853_vm2, 4294967295, %v4841_v27  ;;  %v4847_v10 = vsel %vm3859_vm7, 4294967295, %v4846_v10  ;;  %vm3865_vm6 = vcmp.ge.f32.partialorder %v4849_v22, 10.0  ;;  %v4858_v4 = vunpack.c.h.bf16 %v4853_v52  ;;  %v4911_v3 = vld [vmem:[#allocation59_spill] sm:$0xff] }
 0x169   : > { %4843 = vst [vmem:[#allocation113_spill] sm:$0xff] %v4842_v27  ;;  %4848 = vst [vmem:[#allocation29_spill] sm:$0xff] %v4847_v10  ;;  %v4851_v30 = vsel %vm3865_vm6, 4294967295, %v4850_v30  ;;  %vm3871_vm15 = vcmp.ge.f32.partialorder %v4854_v32, 10.0  ;;  %v4859_v5 = vmov 0  ;;  %v4863_v21 = vunpack.c.l.bf16 %v4862_v50  ;;  %v4906_v27 = vld [vmem:[#allocation54_spill] sm:$0xff] }
 0x16a   : > { %4852 = vst [vmem:[#allocation114_spill] sm:$0xff] %v4851_v30  ;;  %v4856_v37 = vsel %vm3871_vm15, 4294967295, %v4855_v37  ;;  %vm3877_vm2 = vcmp.ge.f32.partialorder %v4858_v4, 10.0  ;;  %v4864_v18 = vmov 0  ;;  %v4867_v22 = vunpack.c.h.bf16 %v4862_v50  ;;  %v404_v50 = vld [vmem:[%s2374_s11 + $0xa0] sm:$0xff] }
 0x16b   : > { %4857 = vst [vmem:[#allocation30_spill] sm:$0xff] %v4856_v37  ;;  %v4860_v5 = vsel %vm3877_vm2, 4294967295, %v4859_v5  ;;  %vm3883_vm7 = vcmp.ge.f32.partialorder %v4863_v21, 10.0  ;;  %v4868_v32 = vmov 0  ;;  %v4872_v52 = vunpack.c.l.bf16 %v4871_v2 }
 0x16c   : > { %4861 = vst [vmem:[#allocation115_spill] sm:$0xff] %v4860_v5  ;;  %v4865_v18 = vsel %vm3883_vm7, 4294967295, %v4864_v18  ;;  %vm3889_vm6 = vcmp.ge.f32.partialorder %v4867_v22, 10.0  ;;  %v4873_v4 = vmov 0  ;;  %v4876_v5 = vunpack.c.h.bf16 %v4871_v2 }
 0x16d   : > { %4866 = vst [vmem:[#allocation31_spill] sm:$0xff] %v4865_v18  ;;  %v4869_v32 = vsel %vm3889_vm6, 4294967295, %v4868_v32  ;;  %vm3895_vm15 = vcmp.ge.f32.partialorder %v4872_v52, 10.0  ;;  %v4877_v21 = vmov 0  ;;  %v385_v52 = vld [vmem:[%s2374_s11 + $0x8] sm:$0xff]  ;;  %vm4884_vm1 = vnez %v4814_v62  ;;  %v4901_v18 = vld [vmem:[#allocation49_spill] sm:$0xff] }
 0x16e   : > { %4870 = vst [vmem:[#allocation116_spill] sm:$0xff] %v4869_v32  ;;  %v4874_v4 = vsel %vm3895_vm15, 4294967295, %v4873_v4  ;;  %vm3901_vm2 = vcmp.ge.f32.partialorder %v4876_v5, 10.0  ;;  %vm4885_vm8 = vnez %v4817_v63  ;;  %vm4886_vm10 = vnez %v4821_v45  ;;  %v4903_v32 = vld [vmem:[#allocation51_spill] sm:$0xff] }
 0x16f   : > { %4875 = vst [vmem:[#allocation32_spill] sm:$0xff] %v4874_v4  ;;  %v4878_v21 = vsel %vm3901_vm2, 4294967295, %v4877_v21  ;;  %vm4887_vm12 = vnez %v4824_v14  ;;  %vm4892_vm9 = vnez %v4847_v10  ;;  %vm4893_vm4 = vnez %v4851_v30  ;;  %v402_v30 = vld [vmem:[%s2374_s11 + $0x90] sm:$0xff]  ;;  %v403_v4 = vld [vmem:[%s2374_s11 + $0x98] sm:$0xff] }
 0x170   : > { %4879 = vst [vmem:[#allocation117_spill] sm:$0xff] %v4878_v21  ;;  %vm4894_vm5 = vnez %v4856_v37  ;;  %v401_v37 = vld [vmem:[%s2374_s11 + $0x88] sm:$0xff]  ;;  %v1184_v2 = vsub.f32 %v384_v46, %v4901_v18  ;;  %v1185_v49 = vsub.f32 %v385_v52, %v4902_v55  ;;  %v1186_v5 = vsub.f32 %v386_v53, %v4903_v32  ;;  %v4907_v21 = vld [vmem:[#allocation55_spill] sm:$0xff]  ;;  %v407_v55 = vld [vmem:[%s2374_s11 + $0xb8] sm:$0xff] }
 0x171   : > { %v1187_v10 = vsub.f32 %v387_v41, %v4904_v43  ;;  %v1188_v17 = vsub.f32 %v388_v57, %v4905_v34  ;;  %v1189_v58 = vsub.f32 %v389_v39, %v4906_v27  ;;  %v1190_v22 = vsub.f32 %v390_v13, %v4907_v21  ;;  %v406_v46 = vld [vmem:[%s2374_s11 + $0xb0] sm:$0xff]  ;;  %v408_v18 = vld [vmem:[%s2374_s11 + $0xc0] sm:$0xff]  ;;  %v4908_v53 = vld [vmem:[#allocation56_spill] sm:$0xff] }
 0x172   : > { %v1191_v32 = vsub.f32 %v391_v36, %v4908_v53  ;;  %v4909_v52 = vld [vmem:[#allocation57_spill] sm:$0xff]  ;;  %v1193_v8 = vsub.f32 %v393_v9, %v4910_v59  ;;  %v1194_v41 = vsub.f32 %v394_v24, %v4911_v3  ;;  %v409_v43 = vld [vmem:[%s2374_s11 + $0xc8] sm:$0xff]  ;;  %v410_v34 = vld [vmem:[%s2374_s11 + $0xd0] sm:$0xff]  ;;  %v1197_v61 = vsub.f32 %v397_v16, %v4914_v12 }
 0x173   : > { %v4895_v28 = vld [vmem:[#allocation115_spill] sm:$0xff]  ;;  %v411_v39 = vld [vmem:[%s2374_s11 + $0xd8] sm:$0xff]  ;;  %v4913_v13 = vld [vmem:[#allocation61_spill] sm:$0xff]  ;;  %v1198_v44 = vsub.f32 %v398_v1, %v4915_v35  ;;  %v1201_v24 = vsub.f32 %v401_v37, %v4918_v40  ;;  %v1208_v23 = vsub.f32 %v408_v18, %v4925_v42 }
 0x174   : > { %vm4896_vm3 = vnez %v4895_v28  ;;  %v1192_v28 = vsub.f32 %v392_v47, %v4909_v52  ;;  %v4912_v57 = vld [vmem:[#allocation60_spill] sm:$0xff]  ;;  %v1196_v21 = vsub.f32 %v396_v6, %v4913_v13  ;;  %v413_v36 = vld [vmem:[%s2374_s11 + $0xe8] sm:$0xff]  ;;  %v414_v53 = vld [vmem:[%s2374_s11 + $0xf0] sm:$0xff] }
 0x175   : > { %v1195_v27 = vsub.f32 %v395_v7, %v4912_v57  ;;  %v4916_v47 = vld [vmem:[#allocation64_spill] sm:$0xff]  ;;  %v4917_v9 = vld [vmem:[#allocation65_spill] sm:$0xff]  ;;  %v4919_v3 = vld [vmem:[#allocation67_spill] sm:$0xff]  ;;  %v1203_v7 = vsub.f32 %v403_v4, %v4920_v31  ;;  %v1213_v31 = vsub.f32 %v413_v36, %v4930_v20  ;;  %v1233_v18 = vmul.f32 %v1201_v24, %v1201_v24 }
 0x176   : > { %v1199_v52 = vsub.f32 %v399_v56, %v4916_v47  ;;  %v1200_v59 = vsub.f32 %v400_v60, %v4917_v9  ;;  %v1202_v38 = vsub.f32 %v402_v30, %v4919_v3  ;;  %v4921_v57 = vld [vmem:[#allocation69_spill] sm:$0xff]  ;;  %v4922_v13 = vld [vmem:[#allocation70_spill] sm:$0xff]  ;;  %v4923_v12 = vld [vmem:[#allocation71_spill] sm:$0xff]  ;;  %v1240_v51 = vmul.f32 %v1208_v23, %v1208_v23 }
 0x177   : > { %v1204_v6 = vsub.f32 %v404_v50, %v4921_v57  ;;  %v1205_v16 = vsub.f32 %v405_v33, %v4922_v13  ;;  %v1206_v35 = vsub.f32 %v406_v46, %v4923_v12  ;;  %v4924_v1 = vld [vmem:[#allocation72_spill] sm:$0xff]  ;;  %v4926_v56 = vld [vmem:[#allocation74_spill] sm:$0xff]  ;;  %v4927_v60 = vld [vmem:[#allocation75_spill] sm:$0xff]  ;;  %v1216_v13 = vmul.f32 %v1184_v2, %v1184_v2 }
 0x178   : > { %v1207_v14 = vsub.f32 %v407_v55, %v4924_v1  ;;  %v1209_v47 = vsub.f32 %v409_v43, %v4926_v56  ;;  %v1210_v9 = vsub.f32 %v410_v34, %v4927_v60  ;;  %v4928_v40 = vld [vmem:[#allocation76_spill] sm:$0xff]  ;;  %v4929_v30 = vld [vmem:[#allocation77_spill] sm:$0xff]  ;;  %v4931_v4 = vld [vmem:[#allocation79_spill] sm:$0xff]  ;;  %v1217_v46 = vmul.f32 %v1185_v49, %v1185_v49 }
 0x179   : > { %v1211_v37 = vsub.f32 %v411_v39, %v4928_v40  ;;  %v1212_v3 = vsub.f32 %v412_v54, %v4929_v30  ;;  %v1214_v50 = vsub.f32 %v414_v53, %v4931_v4  ;;  %v4932_v57 = vld [vmem:[#allocation80_spill] sm:$0xff]  ;;  %v1218_v12 = vmul.f32 %v1186_v5, %v1186_v5  ;;  %v4944_v23 = vld [vmem:[#allocation90_spill] sm:$0xff]  ;;  %v4949_v40 = vld [vmem:[#allocation41_spill] sm:$0xff] }
 0x17a   : > { %v1215_v33 = vsub.f32 %v415_v11, %v4932_v57  ;;  %v1219_v55 = vmul.f32 %v1187_v10, %v1187_v10  ;;  %v1220_v1 = vmul.f32 %v1188_v17, %v1188_v17  ;;  %v1232_v42 = vmul.f32 %v1200_v59, %v1200_v59 }
 0x17b   : > { %v1221_v43 = vmul.f32 %v1189_v58, %v1189_v58  ;;  %v1222_v56 = vmul.f32 %v1190_v22, %v1190_v22  ;;  %v1223_v34 = vmul.f32 %v1191_v32, %v1191_v32  ;;  %v1224_v60 = vmul.f32 %v1192_v28, %v1192_v28 }
 0x17c   : > { %v4065_v39 = vmul.f32 %v1193_v8, %v1193_v8  ;;  %v4067_v54 = vmul.f32 %v1194_v41, %v1194_v41  ;;  %v4069_v20 = vmul.f32 %v1195_v27, %v1195_v27  ;;  %v1234_v36 = vmul.f32 %v1202_v38, %v1202_v38 }
 0x17d   : > { %v4071_v53 = vmul.f32 %v1196_v21, %v1196_v21  ;;  %v4073_v11 = vmul.f32 %v1197_v61, %v1197_v61  ;;  %v4075_v49 = vmul.f32 %v1198_v44, %v1198_v44  ;;  %v1235_v17 = vmul.f32 %v1203_v7, %v1203_v7 }
 0x17e   : > { %v4933_v58 = vsel %vm3715_vm11, 1.0, %v3567_v25  ;;  %v4934_v8 = vsel %vm3721_vm14, 1.0, %v3573_v26  ;;  %v4935_v38 = vsel %vm4884_vm1, 1.0, %v3655_v48  ;;  %v4936_v44 = vsel %vm4885_vm8, 1.0, %v3659_v0  ;;  %v4938_v48 = vld [vmem:[#allocation89_spill] sm:$0xff] }
 0x17f   : > { %v1248_v10 = vmul.f32 %v1216_v13, %v4933_v58  ;;  %v1249_v28 = vmul.f32 %v1217_v46, %v4934_v8  ;;  %v1264_v22 = vmul.f32 %v1232_v42, %v4935_v38  ;;  %v1265_v61 = vmul.f32 %v1233_v18, %v4936_v44  ;;  %v4958_v58 = vld [vmem:[#allocation91_spill] sm:$0xff] }
 0x180   : > { %v4093_v2 = vmul.f32 %v1199_v52, %v1199_v52  ;;  %v1236_v29 = vmul.f32 %v1204_v6, %v1204_v6  ;;  %v1237_v25 = vmul.f32 %v1205_v16, %v1205_v16  ;;  %v1238_v5 = vmul.f32 %v1206_v35, %v1206_v35  ;;  %v4941_v52 = vld [vmem:[#allocation95_spill] sm:$0xff]  ;;  %v4946_v6 = vld [vmem:[#allocation33_spill] sm:$0xff] }
 0x181   : > { %v1239_v32 = vmul.f32 %v1207_v14, %v1207_v14  ;;  %v4937_v26 = vsel %vm3727_vm13, 1.0, %v3577_v15  ;;  %v4939_v41 = vsel %vm4886_vm10, 1.0, %v4938_v48  ;;  %v1241_v27 = vmul.f32 %v1209_v47, %v1209_v47 }
 0x182   : > { %v1250_v62 = vmul.f32 %v1218_v12, %v4937_v26  ;;  %v1266_v63 = vmul.f32 %v1234_v36, %v4939_v41  ;;  %v1242_v0 = vmul.f32 %v1210_v9, %v1210_v9  ;;  %v4942_v59 = vsel %vm3733_vm0, 1.0, %v4941_v52  ;;  %v4952_v12 = vld [vmem:[#allocation18_spill] sm:$0xff]  ;;  %v4966_v26 = vld [vmem:[#allocation97_spill] sm:$0xff]  ;;  %v4970_v41 = vld [vmem:[#allocation92_spill] sm:$0xff] }
 0x183   : > { %v1251_v24 = vmul.f32 %v1219_v55, %v4942_v59  ;;  %v4945_v14 = vsel %vm4887_vm12, 1.0, %v4944_v23  ;;  %v4947_v15 = vunpack.c.l.bf16 %v4946_v6  ;;  %v4948_v45 = vunpack.c.h.bf16 %v4946_v6  ;;  %v4954_v55 = vld [vmem:[#allocation96_spill] sm:$0xff]  ;;  %v4988_v6 = vld [vmem:[#allocation43_spill] sm:$0xff] }
 0x184   : > { %v1267_v19 = vmul.f32 %v1235_v17, %v4945_v14  ;;  %v4950_v30 = vunpack.c.l.bf16 %v4949_v40  ;;  %v4951_v9 = vunpack.c.h.bf16 %v4949_v40  ;;  %v1243_v57 = vmul.f32 %v1211_v37, %v1211_v37  ;;  %v4956_v17 = vld [vmem:[#allocation26_spill] sm:$0xff] }
 0x185   : > { %v1280_v16 = vmul.f32 %v1248_v10, %v4947_v15  ;;  %v1281_v35 = vmul.f32 %v1249_v28, %v4948_v45  ;;  %v4119_v13 = vmul.f32 %v1212_v3, %v1212_v3  ;;  %v4121_v46 = vmul.f32 %v1213_v31, %v1213_v31  ;;  %v4960_v28 = vld [vmem:[#allocation34_spill] sm:$0xff] }
 0x186   : > { %v1296_v47 = vmul.f32 %v1264_v22, %v4950_v30  ;;  %v1297_v4 = vmul.f32 %v1265_v61, %v4951_v9  ;;  %vm4953_vm11 = vnez %v4952_v12  ;;  %v4127_v36 = vmul.f32 %v1214_v50, %v1214_v50  ;;  %v4962_v37 = vld [vmem:[#allocation42_spill] sm:$0xff]  ;;  %v4964_v61 = vld [vmem:[#allocation19_spill] sm:$0xff]  ;;  %v4980_v12 = vld [vmem:[#allocation28_spill] sm:$0xff] }
 0x187   : > { %v4955_v42 = vsel %vm4953_vm11, 1.0, %v4954_v55  ;;  %vm4957_vm14 = vnez %v4956_v17  ;;  %v4961_v38 = vunpack.c.l.bf16 %v4960_v28  ;;  %v4963_v3 = vunpack.c.l.bf16 %v4962_v37  ;;  %v4968_v50 = vld [vmem:[#allocation27_spill] sm:$0xff] }
 0x188   : > { %v1252_v18 = vmul.f32 %v1220_v1, %v4955_v42  ;;  %v4959_v10 = vsel %vm4957_vm14, 1.0, %v4958_v58  ;;  %v4137_v31 = vmul.f32 %v1215_v33, %v1215_v33  ;;  %vm4965_vm13 = vnez %v4964_v61  ;;  %v4984_v42 = vld [vmem:[#allocation35_spill] sm:$0xff]  ;;  %v4991_v61 = vld [vmem:[#allocation108_spill] sm:$0xff] }
 0x189   : > { %v1268_v8 = vmul.f32 %v1236_v29, %v4959_v10  ;;  %v1282_v22 = vmul.f32 %v1250_v62, %v4961_v38  ;;  %v1298_v44 = vmul.f32 %v1266_v63, %v4963_v3  ;;  %v4967_v48 = vsel %vm4965_vm13, 1.0, %v4966_v26  ;;  %v4993_v26 = vld [vmem:[#allocation99_spill] sm:$0xff] }
 0x18a   : > { %v1253_v1 = vmul.f32 %v1221_v43, %v4967_v48  ;;  %vm4969_vm0 = vnez %v4968_v50  ;;  %v4972_v29 = vunpack.c.h.bf16 %v4960_v28  ;;  %v4973_v62 = vunpack.c.h.bf16 %v4962_v37  ;;  %v4978_v43 = vld [vmem:[#allocation98_spill] sm:$0xff]  ;;  %v4995_v50 = vld [vmem:[#allocation113_spill] sm:$0xff] }
 0x18b   : > { %v4971_v21 = vsel %vm4969_vm0, 1.0, %v4970_v41  ;;  %v1314_v23 = vadd.f32 %v1281_v35, %v1280_v16  ;;  %v1315_v63 = vadd.f32 %v1297_v4, %v1296_v47  ;;  %v4974_v33 = vmov %v4947_v15 }
 0x18c   : > { %v1269_v52 = vmul.f32 %v1237_v25, %v4971_v21  ;;  %v1283_v59 = vmul.f32 %v1251_v24, %v4972_v29  ;;  %v1299_v7 = vmul.f32 %v1267_v19, %v4973_v62  ;;  %v4975_v14 = vmov %v4948_v45  ;;  %v4976_v45 = vld [vmem:[#allocation20_spill] sm:$0xff]  ;;  %v4982_v25 = vld [vmem:[#allocation93_spill] sm:$0xff] }
 0x18d   : > { %v1350_v15 = vadd.f32 %v4975_v14, %v4974_v33  ;;  %vm4977_vm1 = vnez %v4976_v45  ;;  %vm4981_vm8 = vnez %v4980_v12  ;;  %v4985_v17 = vunpack.c.l.bf16 %v4984_v42 }
 0x18e   : > { %v4979_v30 = vsel %vm4977_vm1, 1.0, %v4978_v43  ;;  %v4983_v55 = vsel %vm4981_vm8, 1.0, %v4982_v25  ;;  %v4986_v16 = vunpack.c.l.bf16 %v4949_v40  ;;  %v4987_v35 = vunpack.c.h.bf16 %v4949_v40  ;;  %v5010_v25 = vld [vmem:[#allocation36_spill] sm:$0xff] }
 0x18f   : > { %v1254_v9 = vmul.f32 %v1222_v56, %v4979_v30  ;;  %v1270_v24 = vmul.f32 %v1238_v5, %v4983_v55  ;;  %v1284_v19 = vmul.f32 %v1252_v18, %v4985_v17  ;;  %v4989_v4 = vunpack.c.l.bf16 %v4988_v6  ;;  %v4997_v18 = vld [vmem:[#allocation83_spill] sm:$0xff]  ;;  %v5008_v30 = vld [vmem:[#allocation94_spill] sm:$0xff] }
 0x190   : > { %v1351_v47 = vadd.f32 %v4987_v35, %v4986_v16  ;;  %v1316_v10 = vadd.f32 %v1314_v23, %v1282_v22  ;;  %v1317_v38 = vadd.f32 %v1315_v63, %v1298_v44  ;;  %v4990_v56 = vunpack.c.l.bf16 %v4960_v28 }
 0x191   : > { %v1300_v58 = vmul.f32 %v1268_v8, %v4989_v4  ;;  %vm4992_vm10 = vnez %v4991_v61  ;;  %vm4996_vm12 = vnez %v4995_v50  ;;  %v4999_v40 = vunpack.c.h.bf16 %v4984_v42 }
 0x192   : > { %v1352_v3 = vadd.f32 %v1350_v15, %v4990_v56  ;;  %v4994_v5 = vsel %vm4992_vm10, 1.0, %v4993_v26  ;;  %v4998_v41 = vsel %vm4996_vm12, 1.0, %v4997_v18  ;;  %v5000_v8 = vunpack.c.l.bf16 %v4962_v37  ;;  %v5005_v15 = vld [vmem:[#allocation100_spill] sm:$0xff] }
 0x193   : > { %v1255_v48 = vmul.f32 %v1223_v34, %v4994_v5  ;;  %v1271_v21 = vmul.f32 %v1239_v32, %v4998_v41  ;;  %v1285_v29 = vmul.f32 %v1253_v1, %v4999_v40  ;;  %v5001_v44 = vunpack.c.h.bf16 %v4988_v6  ;;  %v5003_v34 = vld [vmem:[#allocation21_spill] sm:$0xff] }
 0x194   : > { %v1353_v22 = vadd.f32 %v1351_v47, %v5000_v8  ;;  %v1318_v23 = vadd.f32 %v1316_v10, %v1283_v59  ;;  %v1319_v63 = vadd.f32 %v1317_v38, %v1299_v7  ;;  %v5002_v33 = vunpack.c.h.bf16 %v4960_v28  ;;  %v5013_v7 = vld [vmem:[#allocation44_spill] sm:$0xff]  ;;  %v5018_v38 = vld [vmem:[#allocation101_spill] sm:$0xff] }
 0x195   : > { %v1301_v62 = vmul.f32 %v1269_v52, %v5001_v44  ;;  %vm5004_vm11 = vnez %v5003_v34  ;;  %v5009_v1 = vsel %vm4892_vm9, 1.0, %v5008_v30  ;;  %v5011_v55 = vunpack.c.l.bf16 %v5010_v25 }
 0x196   : > { %v1354_v14 = vadd.f32 %v1352_v3, %v5002_v33  ;;  %v5006_v45 = vsel %vm5004_vm11, 1.0, %v5005_v15  ;;  %v1272_v12 = vmul.f32 %v1240_v51, %v5009_v1  ;;  %v5012_v52 = vunpack.c.h.bf16 %v4962_v37 }
 0x197   : > { %v1256_v43 = vmul.f32 %v1224_v60, %v5006_v45  ;;  %v1286_v17 = vmul.f32 %v1254_v9, %v5011_v55  ;;  %v5014_v16 = vunpack.c.l.bf16 %v5013_v7  ;;  %v1320_v35 = vadd.f32 %v1318_v23, %v1284_v19  ;;  %v5016_v60 = vld [vmem:[#allocation109_spill] sm:$0xff]  ;;  %v5021_v9 = vld [vmem:[#allocation84_spill] sm:$0xff] }
 0x198   : > { %v1355_v59 = vadd.f32 %v1353_v22, %v5012_v52  ;;  %v1321_v47 = vadd.f32 %v1319_v63, %v1300_v58  ;;  %v5015_v4 = vunpack.c.l.bf16 %v4984_v42  ;;  %vm5017_vm14 = vnez %v5016_v60  ;;  %v5028_v22 = vld [vmem:[#allocation102_spill] sm:$0xff]  ;;  %v5041_v52 = vld [vmem:[#allocation103_spill] sm:$0xff]  ;;  %v5065_v23 = vld [vmem:[#allocation81_spill] sm:$0xff] }
 0x199   : > { %v1302_v28 = vmul.f32 %v1270_v24, %v5014_v16  ;;  %v5019_v56 = vsel %vm5017_vm14, 1.0, %v5018_v38  ;;  %v5022_v61 = vsel %vm4893_vm4, 1.0, %v5021_v9  ;;  %v5023_v26 = vunpack.c.h.bf16 %v5010_v25  ;;  %v5052_v9 = vld [vmem:[#allocation87_spill] sm:$0xff]  ;;  %v5060_v25 = vld [vmem:[#allocation46_spill] sm:$0xff] }
 0x19a   : > { %v1356_v10 = vadd.f32 %v1354_v14, %v5015_v4  ;;  %v1257_v51 = vmul.f32 %v4065_v39, %v5019_v56  ;;  %v1273_v37 = vmul.f32 %v1241_v27, %v5022_v61  ;;  %v5024_v24 = vunpack.c.l.bf16 %v4988_v6  ;;  %v5026_v39 = vld [vmem:[#allocation22_spill] sm:$0xff]  ;;  %v5033_v14 = vld [vmem:[#allocation37_spill] sm:$0xff] }
 0x19b   : > { %v1287_v5 = vmul.f32 %v1255_v48, %v5023_v26  ;;  %v5025_v58 = vunpack.c.h.bf16 %v5013_v7  ;;  %v1322_v18 = vadd.f32 %v1320_v35, %v1285_v29  ;;  %v1323_v41 = vadd.f32 %v1321_v47, %v1301_v62  ;;  %v5031_v48 = vld [vmem:[#allocation85_spill] sm:$0xff] }
 0x19c   : > { %v1357_v19 = vadd.f32 %v1355_v59, %v5024_v24  ;;  %v1358_v8 = vadd.f32 %v1356_v10, %v4999_v40  ;;  %vm5027_vm9 = vnez %v5026_v39  ;;  %v5032_v63 = vsel %vm4894_vm5, 1.0, %v5031_v48  ;;  %v5036_v62 = vld [vmem:[#allocation45_spill] sm:$0xff] }
 0x19d   : > { %v1303_v50 = vmul.f32 %v1271_v21, %v5025_v58  ;;  %v5029_v44 = vsel %vm5027_vm9, 1.0, %v5028_v22  ;;  %v1274_v33 = vmul.f32 %v1242_v0, %v5032_v63  ;;  %v5034_v34 = vunpack.c.l.bf16 %v5033_v14  ;;  %v5057_v58 = vld [vmem:[#allocation38_spill] sm:$0xff] }
 0x19e   : > { %v1258_v27 = vmul.f32 %v4067_v54, %v5029_v44  ;;  %v5035_v21 = vunpack.c.h.bf16 %v4988_v6  ;;  %v5037_v42 = vunpack.c.l.bf16 %v5036_v62  ;;  %v1324_v32 = vadd.f32 %v1322_v18, %v1286_v17  ;;  %v5039_v54 = vld [vmem:[#allocation110_spill] sm:$0xff]  ;;  %v5063_v44 = vld [vmem:[#allocation111_spill] sm:$0xff] }
 0x19f   : > { %v1288_v15 = vmul.f32 %v1256_v43, %v5034_v34  ;;  %v1325_v30 = vadd.f32 %v1323_v41, %v1302_v28  ;;  %v5038_v1 = vmov %v5011_v55  ;;  %vm5040_vm4 = vnez %v5039_v54  ;;  %v5044_v43 = vld [vmem:[#allocation86_spill] sm:$0xff]  ;;  %v5076_v54 = vld [vmem:[#allocation88_spill] sm:$0xff] }
 0x1a0   : > { %v1359_v29 = vadd.f32 %v1357_v19, %v5035_v21  ;;  %v1304_v45 = vmul.f32 %v1272_v12, %v5037_v42  ;;  %v1360_v55 = vadd.f32 %v1358_v8, %v5038_v1  ;;  %v5042_v59 = vsel %vm5040_vm4, 1.0, %v5041_v52 }
 0x1a1   : > { %v1259_v0 = vmul.f32 %v4069_v20, %v5042_v59  ;;  %v5045_v35 = vsel %vm4896_vm3, 1.0, %v5044_v43  ;;  %v5046_v47 = vunpack.c.h.bf16 %v5033_v14  ;;  %v5047_v12 = vunpack.c.l.bf16 %v5013_v7  ;;  %v5050_v20 = vld [vmem:[#allocation23_spill] sm:$0xff] }
 0x1a2   : > { %v1275_v6 = vmul.f32 %v1243_v57, %v5045_v35  ;;  %v5048_v28 = vunpack.c.h.bf16 %v5036_v62  ;;  %v1326_v60 = vadd.f32 %v1324_v32, %v1287_v5  ;;  %v1327_v38 = vadd.f32 %v1325_v30, %v1303_v50  ;;  %v5081_v35 = vld [vmem:[#allocation39_spill] sm:$0xff] }
 0x1a3   : > { %v1289_v4 = vmul.f32 %v1257_v51, %v5046_v47  ;;  %v1361_v17 = vadd.f32 %v1359_v29, %v5047_v12  ;;  %v5049_v56 = vmov %v5023_v26  ;;  %vm5051_vm5 = vnez %v5050_v20  ;;  %v5055_v51 = vld [vmem:[#allocation104_spill] sm:$0xff]  ;;  %v5084_v14 = vld [vmem:[#allocation47_spill] sm:$0xff] }
 0x1a4   : > { %v1305_v10 = vmul.f32 %v1273_v37, %v5048_v28  ;;  %v1362_v3 = vadd.f32 %v1360_v55, %v5049_v56  ;;  %v5053_v61 = vsel %vm5051_vm5, 1.0, %v5052_v9  ;;  %v5056_v24 = vsel %vm3883_vm7, 1.0, %v5055_v51  ;;  %v5074_v55 = vld [vmem:[#allocation24_spill] sm:$0xff]  ;;  %v1348_v59 = vld [vmem:[#allocation3] sm:$0xff] }
 0x1a5   : > { %v1260_v57 = vmul.f32 %v4071_v53, %v5053_v61  ;;  %v1276_v19 = vmul.f32 %v4119_v13, %v5056_v24  ;;  %v5058_v18 = vunpack.c.l.bf16 %v5057_v58  ;;  %v5059_v5 = vunpack.c.h.bf16 %v5013_v7  ;;  %v5087_v56 = vld [vmem:[#allocation112_spill] sm:$0xff]  ;;  %v5092_v61 = vld [vmem:[#allocation107_spill] sm:$0xff] }
 0x1a6   : > { %v5061_v41 = vunpack.c.l.bf16 %v5060_v25  ;;  %v1328_v8 = vadd.f32 %v1326_v60, %v1288_v15  ;;  %v1329_v39 = vadd.f32 %v1327_v38, %v1304_v45  ;;  %v5062_v22 = vmov %v5034_v34 }
 0x1a7   : > { %v1290_v37 = vmul.f32 %v1258_v27, %v5058_v18  ;;  %v1363_v50 = vadd.f32 %v1361_v17, %v5059_v5  ;;  %v1364_v53 = vadd.f32 %v1362_v3, %v5062_v22  ;;  %vm5064_vm3 = vnez %v5063_v44  ;;  %v5068_v27 = vld [vmem:[#allocation105_spill] sm:$0xff]  ;;  %v5089_v3 = vld [vmem:[#allocation82_spill] sm:$0xff] }
 0x1a8   : > { %v1306_v40 = vmul.f32 %v1274_v33, %v5061_v41  ;;  %v5066_v48 = vsel %vm5064_vm3, 1.0, %v5065_v23  ;;  %v5069_v34 = vsel %vm3889_vm6, 1.0, %v5068_v27  ;;  %v5070_v21 = vunpack.c.h.bf16 %v5057_v58 }
 0x1a9   : > { %v1261_v13 = vmul.f32 %v4073_v11, %v5066_v48  ;;  %v1277_v7 = vmul.f32 %v4121_v46, %v5069_v34  ;;  %v5071_v15 = vmov %v5037_v42  ;;  %v5072_v42 = vunpack.c.h.bf16 %v5060_v25 }
 0x1aa   : > { %v1291_v33 = vmul.f32 %v1259_v0, %v5070_v21  ;;  %v1365_v29 = vadd.f32 %v1363_v50, %v5071_v15  ;;  %v1330_v32 = vadd.f32 %v1328_v8, %v1289_v4  ;;  %v1331_v30 = vadd.f32 %v1329_v39, %v1305_v10  ;;  %v5079_v0 = vld [vmem:[#allocation106_spill] sm:$0xff] }
 0x1ab   : > { %v1307_v45 = vmul.f32 %v1275_v6, %v5072_v42  ;;  %v5073_v1 = vmov %v5046_v47  ;;  %vm5075_vm7 = vnez %v5074_v55  ;;  %v5080_v16 = vsel %vm3895_vm15, 1.0, %v5079_v0 }
 0x1ac   : > { %v1366_v11 = vadd.f32 %v1364_v53, %v5073_v1  ;;  %v5077_v52 = vsel %vm5075_vm7, 1.0, %v5076_v54  ;;  %v1278_v43 = vmul.f32 %v4127_v36, %v5080_v16  ;;  %v5082_v47 = vunpack.c.l.bf16 %v5081_v35  ;;  %v5101_v53 = vld [vmem:[#allocation48_spill] sm:$0xff] }
 0x1ad   : > { %v1262_v46 = vmul.f32 %v4075_v49, %v5077_v52  ;;  %v5083_v4 = vmov %v5048_v28  ;;  %v5085_v17 = vunpack.c.l.bf16 %v5084_v14  ;;  %v1332_v10 = vadd.f32 %v1330_v32, %v1290_v37  ;;  %v1312_v52 = vld [vmem:[#allocation2] sm:$0xff] }
 0x1ae   : > { %v1292_v6 = vmul.f32 %v1260_v57, %v5082_v47  ;;  %v1367_v12 = vadd.f32 %v1365_v29, %v5083_v4  ;;  %v1333_v60 = vadd.f32 %v1331_v30, %v1306_v40  ;;  %v5086_v38 = vmov %v5058_v18  ;;  %v5098_v40 = vld [vmem:[#allocation40_spill] sm:$0xff] }
 0x1af   : > { %v1308_v28 = vmul.f32 %v1276_v19, %v5085_v17  ;;  %v1368_v49 = vadd.f32 %v1366_v11, %v5086_v38  ;;  %vm5088_vm6 = vnez %v5087_v56  ;;  %v5093_v57 = vsel %vm3901_vm2, 1.0, %v5092_v61 }
 0x1b0   : > { %v5090_v20 = vsel %vm5088_vm6, 1.0, %v5089_v3  ;;  %v1279_v62 = vmul.f32 %v4137_v31, %v5093_v57  ;;  %v5094_v26 = vunpack.c.h.bf16 %v5081_v35  ;;  %v5095_v24 = vmov %v5061_v41 }
 0x1b1   : > { %v1263_v36 = vmul.f32 %v4093_v2, %v5090_v20  ;;  %v1369_v19 = vadd.f32 %v1367_v12, %v5095_v24  ;;  %v5096_v18 = vunpack.c.h.bf16 %v5084_v14  ;;  %v1334_v5 = vadd.f32 %v1332_v10, %v1291_v33 }
 0x1b2   : > { %v1293_v51 = vmul.f32 %v1261_v13, %v5094_v26  ;;  %v1335_v50 = vadd.f32 %v1333_v60, %v1307_v45  ;;  %v5097_v41 = vmov %v5070_v21  ;;  %v5099_v8 = vunpack.c.l.bf16 %v5098_v40 }
 0x1b3   : > { %v1309_v37 = vmul.f32 %v1277_v7, %v5096_v18  ;;  %v1370_v2 = vadd.f32 %v1368_v49, %v5097_v41  ;;  %v5100_v22 = vmov %v5072_v42  ;;  %v5102_v44 = vunpack.c.l.bf16 %v5101_v53 }
 0x1b4   : > { %v1294_v39 = vmul.f32 %v1262_v46, %v5099_v8  ;;  %v1371_v31 = vadd.f32 %v1369_v19, %v5100_v22  ;;  %v1336_v48 = vadd.f32 %v1334_v5, %v1292_v6  ;;  %v1337_v13 = vadd.f32 %v1335_v50, %v1308_v28  ;;  %v1313_v46 = vld [vmem:[#allocation2 + $0x8] sm:$0xff]  ;;  %v1349_v6 = vld [vmem:[#allocation3 + $0x8] sm:$0xff] }
 0x1b5   : > { %v1310_v23 = vmul.f32 %v1278_v43, %v5102_v44  ;;  %v5103_v63 = vmov %v5082_v47  ;;  %v5104_v34 = vunpack.c.h.bf16 %v5098_v40  ;;  %v5105_v58 = vmov %v5085_v17 }
 0x1b6   : > { %v1372_v27 = vadd.f32 %v1370_v2, %v5103_v63  ;;  %v1373_v21 = vadd.f32 %v1371_v31, %v5105_v58  ;;  %v5106_v33 = vunpack.c.h.bf16 %v5101_v53  ;;  %v1338_v29 = vadd.f32 %v1336_v48, %v1293_v51 }
 0x1b7   : > { %v1295_v7 = vmul.f32 %v1263_v36, %v5104_v34  ;;  %v1339_v25 = vadd.f32 %v1337_v13, %v1309_v37  ;;  %v5107_v42 = vmov %v5094_v26  ;;  %v5108_v32 = vmov %v5096_v18 }
 0x1b8   : > { %v1311_v15 = vmul.f32 %v1279_v62, %v5106_v33  ;;  %v1374_v45 = vadd.f32 %v1372_v27, %v5107_v42  ;;  %v1375_v30 = vadd.f32 %v1373_v21, %v5108_v32  ;;  %v1340_v1 = vadd.f32 %v1338_v29, %v1294_v39 }
 0x1b9   : > { %v1341_v11 = vadd.f32 %v1339_v25, %v1310_v23  ;;  %v5109_v55 = vmov %v5099_v8  ;;  %v5110_v0 = vmov %v5102_v44  ;;  %v5111_v35 = vmov %v5104_v34 }
 0x1ba   : > { %v1376_v54 = vadd.f32 %v1374_v45, %v5109_v55  ;;  %v1377_v16 = vadd.f32 %v1375_v30, %v5110_v0  ;;  %v1342_v43 = vadd.f32 %v1340_v1, %v1295_v7  ;;  %v5112_v12 = vmov %v5106_v33  ;;  %1387 = sbr.rel (%p1596_p8) target bundleno = 616 (0x268), region = 60 }
 0x1bb   : > { %v1343_v47 = vadd.f32 %v1341_v11, %v1311_v15  ;;  %vm1404_vm15 = vcmask (!%p1596_p8), 7168  }
 0x1bc   : > { %v1378_v4 = vadd.f32 %v1376_v54, %v5111_v35  ;;  %v1379_v14 = vadd.f32 %v1377_v16, %v5112_v12  ;;  %v1344_v17 = vadd.f32 %v1342_v43, %v1312_v52 }
 0x1bd   : > { %v1345_v28 = vadd.f32 %v1343_v47, %v1313_v46 }
 0x1be   : > { %v1380_v10 = vadd.f32 %v1378_v4, %v1348_v59  ;;  %v1381_v60 = vadd.f32 %v1379_v14, %v1349_v6  ;;  %1346 = vst [vmem:[#allocation2] sm:$0xff] %v1344_v17 }
 0x1bf   : > { %1347 = vst [vmem:[#allocation2 + $0x8] sm:$0xff] %v1345_v28 }
 0x1c0   : > { %1382 = vst [vmem:[#allocation3] sm:$0xff] %v1380_v10  ;;  %1383 = vst [vmem:[#allocation3 + $0x8] sm:$0xff] %v1381_v60 }
 0x1c5   : > { %v1388_v49 = vld [vmem:[#allocation2] sm:$0xff] }
 0x1c6   : > { %1390 = vadd.xlane.f32.xlu1 %v1388_v49  ;;  %v1389_v3 = vld [vmem:[#allocation2 + $0x8] sm:$0xff] }
 0x1c7   : > { %v1394_v38 = vld [vmem:[#allocation3] sm:$0xff]  ;;  %v1395_v56 = vld [vmem:[#allocation3 + $0x8] sm:$0xff] }
 0x1c8   : > { %1396 = vadd.xlane.f32.xlu0 %v1394_v38 }
 0x1ca   : > { %1392 = vadd.xlane.f32.xlu1 %v1389_v3 }
 0x1cc   : > { %1398 = vadd.xlane.f32.xlu0 %v1395_v56 }
 0x253   : > { %v1391_v9 = vpop.xlane.xlu1 %1390 }
 0x255   : > { %v1397_v20 = vpop.xlane.xlu0 %1396 }
 0x256   : > { %1887 = vrcp.f32 %v1397_v20 }
 0x257   : > { %v1393_v62 = vpop.xlane.xlu1 %1392 }
 0x259   : > { %v1399_v36 = vpop.xlane.xlu0 %1398 }
 0x25a   : > { %1889 = vrcp.f32 %v1399_v36 }
 0x260   : > { %v1888_v61 = vpop.eup %1887 }
 0x261   : > { %v1401_v57 = vmul.f32 %v1888_v61, %v1391_v9 }
 0x263   : > { %1405 = vst.msk [vmem:[%s2400_s30] sm:$0xff] %vm1404_vm15, %v1401_v57 }
 0x264   : > { %v1890_v26 = vpop.eup %1889 }
 0x265   : > { %v1403_v51 = vmul.f32 %v1890_v26, %v1393_v62 }
 0x267   : > { %1406 = vst.msk [vmem:[%s2400_s30 + $0x8] sm:$0xff] %vm1404_vm15, %v1403_v51 }
 0x268 PF: > { %s23_s22 = sadd.s32 1, %s2085_s22   ;;  %s5113_s19 = sld [smem:[#allocation14_spill]] }
 0x269   : > { %p20_p9 = scmp.ge.s32.totalorder %s23_s22, 6   ;;  %s5114_s29 = sld [smem:[#allocation15_spill]] }
 0x26a   : > { %s5115_s21 = sld [smem:[#allocation16_spill]]  ;;  %s5116_s15 = smov %s2061_s16 }
 0x26b   : > { %s5117_s16 = smov %s2065_s17  ;;  %s5118_s17 = smov %s2195_s10 }
 0x26c   : > { %s5119_s18 = smov %s2077_s20  ;;  %22 = sbr.rel (!%p20_p9) target bundleno = 12 (0xc), region = 121 }
 0x26f   : > { %s5120_s20 = smov %s5114_s29 }
 0x273   :  { %1429 = vsyncpa [#allocation5], 1 }
 0x274   :  { %1431 = vsyncpa [#allocation5 + $0x1], 1 }
 0x275   :  { %1432 = vsyncpa [#allocation7], 1 }
 0x276   :  { %1434 = vsyncpa [#allocation7 + $0x1], 1 }
 0x277   :  { %1435 = vsyncpa [#allocation10], 1 }
 0x278   :  { %1437 = vsyncpa [#allocation10 + $0x1], 1 }

</bundles_post_ra>
